<compile_context>
chip_gen: v7x
topology: tpu7x:2x2x1
jax: 0.10.0
libtpu: 0.0.40
codegen_flags: <defaults>
</compile_context>

<pallas_src>
import jax
import jax.numpy as jnp
from jax import lax
from jax.experimental import pallas as pl
from jax.experimental.pallas import tpu as pltpu

# ---------------------------------------------------------------------------
# Synthetic config / constants (stand-ins for InterWild's cfg / mano modules)
# ---------------------------------------------------------------------------
INPUT_HM_SHAPE = (8, 16, 16)        # cfg.input_hm_shape  (D, H, W)
OUTPUT_HAND_HM_SHAPE = (8, 8, 8)    # cfg.output_hand_hm_shape
SIGMA = 2.5                         # cfg.sigma
JOINT_NUM = 4                       # mano.sh_joint_num  (small synthetic value)
ROOT_JOINT_IDX = 0                  # mano.sh_root_joint_idx
FEAT_DIM = 512                      # backbone 'late' output channels

D_HM, H_HM, W_HM = INPUT_HM_SHAPE
C_IN = JOINT_NUM * 2 * D_HM         # conv input channels (64 here)
C_OUT = 64                          # conv output channels
POOL = 8                            # synthetic backbone: 8x8 avg pool
HF, WF = H_HM // POOL, W_HM // POOL # pooled feature map (2, 2)
N_POOL = HF * WF                    # 4 pooled spatial positions
_INV_2SIG2 = 0.5 / (SIGMA * SIGMA)


# ---------------------------------------------------------------------------
# Fused Pallas kernel: heatmap render -> 3x3 conv+BN+ReLU -> 8x8 avgpool ->
# 1x1 projection(512)+ReLU.  One grid step = one batch sample.
# ---------------------------------------------------------------------------
def _fused_kernel(params_ref, convw_ref, convb_ref, pool_ref, projw_ref,
                  projb_ref, feat_ref, hm_ref):
    # params_ref : (1, 3, C_IN)  rows = x, y, (d - z)^2 per heatmap channel
    # convw_ref  : (9, C_IN, C_OUT) bf16, BN scale folded, index kh*3+kw
    # convb_ref  : (1, C_OUT) f32 folded BN bias
    # pool_ref   : (N_POOL, H*W) f32 averaging matrix
    # projw_ref  : (C_OUT, FEAT_DIM) bf16
    # projb_ref  : (1, FEAT_DIM) f32
    # feat_ref   : (1, N_POOL, FEAT_DIM) f32 output block
    # hm_ref     : VMEM scratch (H+2, W+2, C_IN) f32, zero-padded heatmap slab
    HP, WP = H_HM + 2, W_HM + 2

    # --- 1) Separable Gaussian rendering (zero-padded border folded in) ----
    p = params_ref[0]                                   # (3, C_IN)
    x = p[0:1, :]                                       # (1, C_IN)
    y = p[1:2, :]
    zsq = p[2:3, :]

    col = lax.broadcasted_iota(jnp.int32, (WP, C_IN), 0)
    row = lax.broadcasted_iota(jnp.int32, (HP, C_IN), 0)
    fx = (col - 1).astype(jnp.float32)                  # grid x in [-1, W]
    fy = (row - 1).astype(jnp.float32)                  # grid y in [-1, H]

    gx = jnp.exp(-((fx - x) ** 2) * _INV_2SIG2)                      # (WP, C)
    gy = jnp.exp(-(((fy - y) ** 2) + zsq) * _INV_2SIG2) * 255.0      # (HP, C)
    gx = jnp.where((col >= 1) & (col <= W_HM), gx, 0.0)  # zero x-padding cols
    gy = jnp.where((row >= 1) & (row <= H_HM), gy, 0.0)  # zero y-padding rows

    # outer product -> full padded channel-last heatmap slab (HP, WP, C_IN)
    hm_ref[...] = gy[:, None, :] * gx[None, :, :]

    # --- 2) 3x3 conv (pad=1) as 9 shifted matmuls, bf16 on MXU, f32 acc ----
    acc = jnp.zeros((H_HM * W_HM, C_OUT), jnp.float32)
    for kh in range(3):
        for kw in range(3):
            a = hm_ref[kh:kh + H_HM, kw:kw + W_HM, :].reshape(H_HM * W_HM, C_IN)
            acc = acc + jnp.dot(a.astype(jnp.bfloat16),
                                convw_ref[kh * 3 + kw],
                                preferred_element_type=jnp.float32)
    acc = jnp.maximum(acc + convb_ref[...], 0.0)         # (H*W, C_OUT)

    # --- 3) 8x8 average pool as a matmul ------------------------------------
    pooled = jnp.dot(pool_ref[...], acc,
                     preferred_element_type=jnp.float32)  # (N_POOL, C_OUT)

    # --- 4) 1x1 projection to FEAT_DIM + ReLU (lane-dense 512-wide store) ---
    feat = jnp.dot(pooled.astype(jnp.bfloat16), projw_ref[...],
                   preferred_element_type=jnp.float32) + projb_ref[...]
    feat_ref[0] = jnp.maximum(feat, 0.0)                 # (N_POOL, FEAT_DIM)


def fused_transnet_features(hm_params, conv_w9, conv_b, pool_mat, proj_w, proj_b):
    """hm_params: (B, 3, C_IN). Returns hand features (B, N_POOL, FEAT_DIM)."""
    B = hm_params.shape[0]
    grid_spec = pltpu.PrefetchScalarGridSpec(
        num_scalar_prefetch=0,
        grid=(B,),
        in_specs=[
            pl.BlockSpec((1, 3, C_IN), lambda b: (b, 0, 0)),
            pl.BlockSpec((9, C_IN, C_OUT), lambda b: (0, 0, 0)),
            pl.BlockSpec((1, C_OUT), lambda b: (0, 0)),
            pl.BlockSpec((N_POOL, H_HM * W_HM), lambda b: (0, 0)),
            pl.BlockSpec((C_OUT, FEAT_DIM), lambda b: (0, 0)),
            pl.BlockSpec((1, FEAT_DIM), lambda b: (0, 0)),
        ],
        out_specs=pl.BlockSpec((1, N_POOL, FEAT_DIM), lambda b: (b, 0, 0)),
        scratch_shapes=[pltpu.VMEM((H_HM + 2, W_HM + 2, C_IN), jnp.float32)],
    )
    return pl.pallas_call(
        _fused_kernel,
        out_shape=jax.ShapeDtypeStruct((B, N_POOL, FEAT_DIM), jnp.float32),
        grid_spec=grid_spec,
        compiler_params=pltpu.CompilerParams(dimension_semantics=("parallel",)),
    )(hm_params, conv_w9, conv_b, pool_mat, proj_w, proj_b)


# ---------------------------------------------------------------------------
# JAX glue: bbox math, heatmap params, bilinear sampling, tiny fc
# ---------------------------------------------------------------------------
def _get_bbox(joint_img):
    x, y = joint_img[:, :, 0], joint_img[:, :, 1]
    xmin, xmax = x.min(axis=1), x.max(axis=1)
    ymin, ymax = y.min(axis=1), y.max(axis=1)
    xc, w = (xmin + xmax) / 2.0, xmax - xmin
    xmin, xmax = xc - 0.5 * w * 1.2, xc + 0.5 * w * 1.2
    yc, h = (ymin + ymax) / 2.0, ymax - ymin
    ymin, ymax = yc - 0.5 * h * 1.2, yc + 0.5 * h * 1.2
    return jnp.stack([xmin, ymin, xmax, ymax], axis=1)


def _set_aspect_ratio(bbox, aspect_ratio=1.0):
    w = bbox[:, 2] - bbox[:, 0]
    h = bbox[:, 3] - bbox[:, 1]
    c_x = bbox[:, 0] + w / 2.0
    c_y = bbox[:, 1] + h / 2.0
    new_h = jnp.where(w > aspect_ratio * h, w / aspect_ratio, h)
    new_w = jnp.where(w < aspect_ratio * h, h * aspect_ratio, w)
    xmin = c_x - new_w / 2.0
    ymin = c_y - new_h / 2.0
    return jnp.stack([xmin, ymin, new_w + xmin, new_h + ymin], axis=1)


def _heatmap_params(coords):
    """coords: (B, 2J, 3) in input_hm space -> per-channel (x, y, (d-z)^2),
    channel order c = hand*J*D + j*D + d (matches torch view/cat order)."""
    B, two_j, _ = coords.shape
    x = jnp.repeat(coords[:, :, 0], D_HM, axis=1)                 # (B, C_IN)
    y = jnp.repeat(coords[:, :, 1], D_HM, axis=1)
    z = jnp.repeat(coords[:, :, 2], D_HM, axis=1)
    d = jnp.tile(jnp.arange(D_HM, dtype=jnp.float32), two_j)[None, :]
    zsq = (d - z) ** 2
    return jnp.stack([x, y, zsq], axis=1)                         # (B, 3, C_IN)


def _make_pool_matrix():
    r = jnp.arange(H_HM * W_HM)
    blk = (r // W_HM) // POOL * WF + (r % W_HM) // POOL
    p = jnp.arange(N_POOL)
    return (blk[None, :] == p[:, None]).astype(jnp.float32) / float(POOL * POOL)


def _bilinear_sample_nhwc(feat, pts):
    """feat: (B, Hf, Wf, C); pts: (B, P, 2) pixel coords (x, y); zero padding,
    align_corners=True pixel-coord semantics. Returns (B, P, C)."""
    # TODO(synk): exact torch grid_sample border behavior assumed via raw pixel
    # coords (sample_joint_features normalizes with (size-1), align_corners=True).
    B, Hf, Wf, C = feat.shape
    x, y = pts[..., 0], pts[..., 1]
    x0, y0 = jnp.floor(x), jnp.floor(y)
    x1, y1 = x0 + 1.0, y0 + 1.0
    wx1, wy1 = x - x0, y - y0
    wx0, wy0 = 1.0 - wx1, 1.0 - wy1

    def gather(xi, yi):
        valid = (xi >= 0) & (xi <= Wf - 1) & (yi >= 0) & (yi <= Hf - 1)
        xc = jnp.clip(xi, 0, Wf - 1).astype(jnp.int32)
        yc = jnp.clip(yi, 0, Hf - 1).astype(jnp.int32)
        b_idx = jnp.arange(B)[:, None]
        g = feat[b_idx, yc, xc, :]                       # (B, P, C)
        return g * valid[..., None].astype(feat.dtype)

    return (gather(x0, y0) * (wx0 * wy0)[..., None]
            + gather(x1, y0) * (wx1 * wy0)[..., None]
            + gather(x0, y1) * (wx0 * wy1)[..., None]
            + gather(x1, y1) * (wx1 * wy1)[..., None])


# ---------------------------------------------------------------------------
# Full forward pass
# ---------------------------------------------------------------------------
def transnet_forward(params, rjoint_img, ljoint_img, rhand_bbox, lhand_bbox):
    D, Hh, Wh = INPUT_HM_SHAPE
    oD, oH, oW = OUTPUT_HAND_HM_SHAPE
    B = rjoint_img.shape[0]

    def to_img_space(coord, bbox):
        x = coord[:, :, 0] * ((bbox[:, None, 2] - bbox[:, None, 0]) / oW) + bbox[:, None, 0]
        y = coord[:, :, 1] * ((bbox[:, None, 3] - bbox[:, None, 1]) / oH) + bbox[:, None, 1]
        return jnp.stack([x, y, coord[:, :, 2]], axis=2)

    ljoint = to_img_space(ljoint_img, lhand_bbox)
    rjoint = to_img_space(rjoint_img, rhand_bbox)

    rbb = _get_bbox(rjoint)
    lbb = _get_bbox(ljoint)
    union = jnp.stack([
        jnp.minimum(lbb[:, 0], rbb[:, 0]),
        jnp.minimum(lbb[:, 1], rbb[:, 1]),
        jnp.maximum(lbb[:, 2], rbb[:, 2]),
        jnp.maximum(lbb[:, 3], rbb[:, 3]),
    ], axis=1)
    union = _set_aspect_ratio(union, 1.0)

    def to_union_hm(coord):
        x = (coord[:, :, 0] - union[:, None, 0]) * (Wh / (union[:, None, 2] - union[:, None, 0]))
        y = (coord[:, :, 1] - union[:, None, 1]) * (Hh / (union[:, None, 3] - union[:, None, 1]))
        z = coord[:, :, 2] * (D / oD)
        return jnp.stack([x, y, z], axis=2)

    rjoint = to_union_hm(rjoint)
    ljoint = to_union_hm(ljoint)

    # Per-channel heatmap parameters, channel order = [rhand, lhand]
    coords_all = jnp.concatenate([rjoint, ljoint], axis=1)        # (B, 2J, 3)
    hm_params = _heatmap_params(coords_all)                       # (B, 3, C_IN)

    # Fold BN scale into conv weights; kernel-index-major bf16 layout.
    conv_w9 = (jnp.transpose(params["conv_w"], (2, 3, 1, 0)).reshape(9, C_IN, C_OUT)
               * params["conv_scale"][None, None, :]).astype(jnp.bfloat16)
    conv_b = params["conv_bias"].reshape(1, C_OUT).astype(jnp.float32)
    proj_w = params["backbone_w"].astype(jnp.bfloat16)            # (C_OUT, 512)
    proj_b = params["backbone_b"].reshape(1, FEAT_DIM).astype(jnp.float32)
    pool_mat = _make_pool_matrix()

    # TODO(synk): the real TransNet uses an injected ResNet backbone 'late'
    # stage; here it is a synthetic 8x8 avg-pool + 1x1 projection (fused).
    hand_feat = fused_transnet_features(hm_params, conv_w9, conv_b, pool_mat,
                                        proj_w, proj_b)           # (B, 4, 512)
    hand_feat = hand_feat.reshape(B, HF, WF, FEAT_DIM)            # channel-last

    wrist = jnp.stack([rjoint[:, ROOT_JOINT_IDX, :], ljoint[:, ROOT_JOINT_IDX, :]], axis=1)
    wrist_img = jnp.stack([wrist[:, :, 0] / 8.0, wrist[:, :, 1] / 8.0], axis=2)  # (B, 2, 2)

    wrist_feat = _bilinear_sample_nhwc(hand_feat, wrist_img)      # (B, 2, 512)
    wrist_feat = jnp.concatenate([wrist_feat, wrist_img], axis=2).reshape(-1, 2 * (FEAT_DIM + 2))

    # Final fc: M=B, K=1028, N=3 -> too small for a kernel launch; plain jnp.
    rel_trans = wrist_feat @ params["fc_w"] + params["fc_b"]
    return rel_trans


# ---------------------------------------------------------------------------
# Deterministic parameter init (shapes follow TransNet.__init__)
# ---------------------------------------------------------------------------
def init_params(key):
    ks = jax.random.split(key, 8)
    conv_w = jax.random.normal(ks[0], (C_OUT, C_IN, 3, 3), jnp.float32) * 0.05
    conv_b = jax.random.normal(ks[1], (C_OUT,), jnp.float32) * 0.05
    bn_gamma = 1.0 + 0.1 * jax.random.normal(ks[2], (C_OUT,), jnp.float32)
    bn_beta = 0.1 * jax.random.normal(ks[3], (C_OUT,), jnp.float32)
    bn_mean = jnp.zeros((C_OUT,), jnp.float32)
    bn_var = jnp.ones((C_OUT,), jnp.float32)
    s = bn_gamma / jnp.sqrt(bn_var + 1e-5)        # eval-mode BN folded
    backbone_w = jax.random.normal(ks[4], (C_OUT, FEAT_DIM), jnp.float32) * 0.05
    backbone_b = 0.05 * jax.random.normal(ks[5], (FEAT_DIM,), jnp.float32)
    fc_w = (jax.random.normal(ks[6], (3, 2 * (FEAT_DIM + 2)), jnp.float32) * 0.02).T
    fc_b = jax.random.normal(ks[7], (3,), jnp.float32) * 0.02
    return dict(conv_w=conv_w, conv_scale=s,
                conv_bias=bn_beta + (conv_b - bn_mean) * s,
                backbone_w=backbone_w, backbone_b=backbone_b,
                fc_w=fc_w, fc_b=fc_b)


if __name__ == "__main__":
    B = 2
    key = jax.random.PRNGKey(0)
    kp, k1, k2, k3, k4 = jax.random.split(key, 5)
    params = init_params(kp)

    # joint coords in output_hand_hm space, bboxes in image space (xyxy)
    rjoint_img = jax.random.uniform(k1, (B, JOINT_NUM, 3), jnp.float32) * 8.0
    ljoint_img = jax.random.uniform(k2, (B, JOINT_NUM, 3), jnp.float32) * 8.0

    def make_bbox(k):
        ka, kb = jax.random.split(k)
        xy = jax.random.uniform(ka, (B, 2), jnp.float32) * 50.0
        wh = 20.0 + jax.random.uniform(kb, (B, 2), jnp.float32) * 40.0
        return jnp.concatenate([xy, xy + wh], axis=1)

    rhand_bbox = make_bbox(k3)
    lhand_bbox = make_bbox(k4)

    fwd = jax.jit(transnet_forward)
    rel_trans = fwd(params, rjoint_img, ljoint_img, rhand_bbox, lhand_bbox)
    jax.block_until_ready(rel_trans)
    assert rel_trans.shape == (B, 3) and rel_trans.dtype == jnp.float32
    print("KERNEL_OK")
</pallas_src>

<mosaic_0001>
module attributes {stable_mosaic.version = 11 : i64} {
  func.func @_fused_kernel(%arg0: i32, %arg1: memref<1x3x64xf32, #tpu.memory_space<vmem>>, %arg2: memref<9x64x64xbf16, #tpu.memory_space<vmem>>, %arg3: memref<1x64xf32, #tpu.memory_space<vmem>>, %arg4: memref<4x256xf32, #tpu.memory_space<vmem>>, %arg5: memref<64x512xbf16, #tpu.memory_space<vmem>>, %arg6: memref<1x512xf32, #tpu.memory_space<vmem>>, %arg7: memref<1x4x512xf32, #tpu.memory_space<vmem>>, %arg8: memref<18x18x64xf32, #tpu.memory_space<vmem>>) attributes {dimension_semantics = [#tpu.dimension_semantics<parallel>], iteration_bounds = array<i64: 2>, scalar_prefetch = 0 : i64, scratch_operands = 1 : i64, tpu.core_type = #tpu.core_type<tc>, window_params = [{transform_indices = @transform_0, window_bounds = array<i64: 1, 3, 64>}, {pipeline_mode = #tpu.pipeline_mode<synchronous>, transform_indices = @transform_1, window_bounds = array<i64: 9, 64, 64>}, {pipeline_mode = #tpu.pipeline_mode<synchronous>, transform_indices = @transform_2, window_bounds = array<i64: 1, 64>}, {pipeline_mode = #tpu.pipeline_mode<synchronous>, transform_indices = @transform_3, window_bounds = array<i64: 4, 256>}, {pipeline_mode = #tpu.pipeline_mode<synchronous>, transform_indices = @transform_4, window_bounds = array<i64: 64, 512>}, {pipeline_mode = #tpu.pipeline_mode<synchronous>, transform_indices = @transform_5, window_bounds = array<i64: 1, 512>}, {transform_indices = @transform_6, window_bounds = array<i64: 1, 4, 512>}]} {
    %c0 = arith.constant 0 : index
    %c0_0 = arith.constant 0 : index
    %c0_1 = arith.constant 0 : index
    %0 = vector.load %arg1[%c0, %c0_0, %c0_1] : memref<1x3x64xf32, #tpu.memory_space<vmem>>, vector<1x3x64xf32>
    %1 = vector.shape_cast %0 : vector<1x3x64xf32> to vector<3x64xf32>
    %2 = vector.extract_strided_slice %1 {offsets = [0, 0], sizes = [1, 64], strides = [1, 1]} : vector<3x64xf32> to vector<1x64xf32>
    %3 = vector.extract_strided_slice %1 {offsets = [1, 0], sizes = [1, 64], strides = [1, 1]} : vector<3x64xf32> to vector<1x64xf32>
    %4 = vector.extract_strided_slice %1 {offsets = [2, 0], sizes = [1, 64], strides = [1, 1]} : vector<3x64xf32> to vector<1x64xf32>
    %5 = tpu.iota {dimensions = array<i32: 0>} : vector<18x64xi32>
    %6 = tpu.iota {dimensions = array<i32: 0>} : vector<18x64xi32>
    %c1_i32 = arith.constant 1 : i32
    %7 = vector.broadcast %c1_i32 : i32 to vector<18x64xi32>
    %8 = arith.subi %5, %7 : vector<18x64xi32>
    %9 = arith.sitofp %8 : vector<18x64xi32> to vector<18x64xf32>
    %c1_i32_2 = arith.constant 1 : i32
    %10 = vector.broadcast %c1_i32_2 : i32 to vector<18x64xi32>
    %11 = arith.subi %6, %10 : vector<18x64xi32>
    %12 = arith.sitofp %11 : vector<18x64xi32> to vector<18x64xf32>
    %13 = vector.broadcast %2 : vector<1x64xf32> to vector<18x64xf32>
    %14 = arith.subf %9, %13 : vector<18x64xf32>
    %15 = arith.mulf %14, %14 : vector<18x64xf32>
    %cst = arith.constant 0.000000e+00 : f32
    %16 = vector.broadcast %cst : f32 to vector<18x64xf32>
    %17 = arith.subf %16, %15 : vector<18x64xf32>
    %cst_3 = arith.constant 8.000000e-02 : f32
    %18 = vector.broadcast %cst_3 : f32 to vector<18x64xf32>
    %19 = arith.mulf %17, %18 : vector<18x64xf32>
    %20 = math.exp %19 : vector<18x64xf32>
    %21 = vector.broadcast %3 : vector<1x64xf32> to vector<18x64xf32>
    %22 = arith.subf %12, %21 : vector<18x64xf32>
    %23 = arith.mulf %22, %22 : vector<18x64xf32>
    %24 = vector.broadcast %4 : vector<1x64xf32> to vector<18x64xf32>
    %25 = arith.addf %23, %24 : vector<18x64xf32>
    %cst_4 = arith.constant 0.000000e+00 : f32
    %26 = vector.broadcast %cst_4 : f32 to vector<18x64xf32>
    %27 = arith.subf %26, %25 : vector<18x64xf32>
    %cst_5 = arith.constant 8.000000e-02 : f32
    %28 = vector.broadcast %cst_5 : f32 to vector<18x64xf32>
    %29 = arith.mulf %27, %28 : vector<18x64xf32>
    %30 = math.exp %29 : vector<18x64xf32>
    %cst_6 = arith.constant 2.550000e+02 : f32
    %31 = vector.broadcast %cst_6 : f32 to vector<18x64xf32>
    %32 = arith.mulf %30, %31 : vector<18x64xf32>
    %c1_i32_7 = arith.constant 1 : i32
    %33 = vector.broadcast %c1_i32_7 : i32 to vector<18x64xi32>
    %34 = arith.cmpi sge, %5, %33 : vector<18x64xi32>
    %c16_i32 = arith.constant 16 : i32
    %35 = vector.broadcast %c16_i32 : i32 to vector<18x64xi32>
    %36 = arith.cmpi sle, %5, %35 : vector<18x64xi32>
    %37 = arith.andi %34, %36 : vector<18x64xi1>
    %cst_8 = arith.constant 0.000000e+00 : f32
    %38 = vector.broadcast %cst_8 : f32 to vector<18x64xf32>
    %39 = arith.select %37, %20, %38 : vector<18x64xi1>, vector<18x64xf32>
    %c1_i32_9 = arith.constant 1 : i32
    %40 = vector.broadcast %c1_i32_9 : i32 to vector<18x64xi32>
    %41 = arith.cmpi sge, %6, %40 : vector<18x64xi32>
    %c16_i32_10 = arith.constant 16 : i32
    %42 = vector.broadcast %c16_i32_10 : i32 to vector<18x64xi32>
    %43 = arith.cmpi sle, %6, %42 : vector<18x64xi32>
    %44 = arith.andi %41, %43 : vector<18x64xi1>
    %cst_11 = arith.constant 0.000000e+00 : f32
    %45 = vector.broadcast %cst_11 : f32 to vector<18x64xf32>
    %46 = arith.select %44, %32, %45 : vector<18x64xi1>, vector<18x64xf32>
    %47 = vector.shape_cast %46 : vector<18x64xf32> to vector<18x1x64xf32>
    %48 = vector.shape_cast %39 : vector<18x64xf32> to vector<1x18x64xf32>
    %49 = vector.broadcast %47 : vector<18x1x64xf32> to vector<18x18x64xf32>
    %50 = vector.broadcast %48 : vector<1x18x64xf32> to vector<18x18x64xf32>
    %51 = arith.mulf %49, %50 : vector<18x18x64xf32>
    %c0_12 = arith.constant 0 : index
    %c0_13 = arith.constant 0 : index
    %c0_14 = arith.constant 0 : index
    %52 = vector.load %arg8[%c0_12, %c0_13, %c0_14] : memref<18x18x64xf32, #tpu.memory_space<vmem>>, vector<18x18x64xf32>
    tpu.vector_store %arg8[%c0_12, %c0_13, %c0_14], %51 {strides = array<i32>} : memref<18x18x64xf32, #tpu.memory_space<vmem>>, vector<18x18x64xf32>,
    %cst_15 = arith.constant 0.000000e+00 : f32
    %53 = vector.broadcast %cst_15 : f32 to vector<256x64xf32>
    %c0_16 = arith.constant 0 : index
    %c0_17 = arith.constant 0 : index
    %c0_18 = arith.constant 0 : index
    %54 = vector.load %arg8[%c0_16, %c0_17, %c0_18] : memref<18x18x64xf32, #tpu.memory_space<vmem>>, vector<16x16x64xf32>
    %55 = vector.shape_cast %54 : vector<16x16x64xf32> to vector<256x64xf32>
    %56 = arith.truncf %55 : vector<256x64xf32> to vector<256x64xbf16>
    %c0_19 = arith.constant 0 : index
    %c0_20 = arith.constant 0 : index
    %c0_21 = arith.constant 0 : index
    %57 = vector.load %arg2[%c0_19, %c0_20, %c0_21] : memref<9x64x64xbf16, #tpu.memory_space<vmem>>, vector<1x64x64xbf16>
    %58 = vector.shape_cast %57 : vector<1x64x64xbf16> to vector<64x64xbf16>
    %cst_22 = arith.constant dense<0.000000e+00> : vector<256x64xf32>
    %59 = tpu.matmul %56, %58, %cst_22 {dimension_numbers = #tpu.dot_dimension_numbers<[1], [0], [0], [1], [0, 0, 1, 1], [], []>} : vector<256x64xbf16>, vector<64x64xbf16>, vector<256x64xf32> -> vector<256x64xf32>
    %60 = arith.addf %53, %59 : vector<256x64xf32>
    %c0_23 = arith.constant 0 : index
    %c1 = arith.constant 1 : index
    %c0_24 = arith.constant 0 : index
    %61 = vector.load %arg8[%c0_23, %c1, %c0_24] : memref<18x18x64xf32, #tpu.memory_space<vmem>>, vector<16x16x64xf32>
    %62 = vector.shape_cast %61 : vector<16x16x64xf32> to vector<256x64xf32>
    %63 = arith.truncf %62 : vector<256x64xf32> to vector<256x64xbf16>
    %c1_25 = arith.constant 1 : index
    %c0_26 = arith.constant 0 : index
    %c0_27 = arith.constant 0 : index
    %64 = vector.load %arg2[%c1_25, %c0_26, %c0_27] : memref<9x64x64xbf16, #tpu.memory_space<vmem>>, vector<1x64x64xbf16>
    %65 = vector.shape_cast %64 : vector<1x64x64xbf16> to vector<64x64xbf16>
    %cst_28 = arith.constant dense<0.000000e+00> : vector<256x64xf32>
    %66 = tpu.matmul %63, %65, %cst_28 {dimension_numbers = #tpu.dot_dimension_numbers<[1], [0], [0], [1], [0, 0, 1, 1], [], []>} : vector<256x64xbf16>, vector<64x64xbf16>, vector<256x64xf32> -> vector<256x64xf32>
    %67 = arith.addf %60, %66 : vector<256x64xf32>
    %c0_29 = arith.constant 0 : index
    %c2 = arith.constant 2 : index
    %c0_30 = arith.constant 0 : index
    %68 = vector.load %arg8[%c0_29, %c2, %c0_30] : memref<18x18x64xf32, #tpu.memory_space<vmem>>, vector<16x16x64xf32>
    %69 = vector.shape_cast %68 : vector<16x16x64xf32> to vector<256x64xf32>
    %70 = arith.truncf %69 : vector<256x64xf32> to vector<256x64xbf16>
    %c2_31 = arith.constant 2 : index
    %c0_32 = arith.constant 0 : index
    %c0_33 = arith.constant 0 : index
    %71 = vector.load %arg2[%c2_31, %c0_32, %c0_33] : memref<9x64x64xbf16, #tpu.memory_space<vmem>>, vector<1x64x64xbf16>
    %72 = vector.shape_cast %71 : vector<1x64x64xbf16> to vector<64x64xbf16>
    %cst_34 = arith.constant dense<0.000000e+00> : vector<256x64xf32>
    %73 = tpu.matmul %70, %72, %cst_34 {dimension_numbers = #tpu.dot_dimension_numbers<[1], [0], [0], [1], [0, 0, 1, 1], [], []>} : vector<256x64xbf16>, vector<64x64xbf16>, vector<256x64xf32> -> vector<256x64xf32>
    %74 = arith.addf %67, %73 : vector<256x64xf32>
    %c1_35 = arith.constant 1 : index
    %c0_36 = arith.constant 0 : index
    %c0_37 = arith.constant 0 : index
    %75 = vector.load %arg8[%c1_35, %c0_36, %c0_37] : memref<18x18x64xf32, #tpu.memory_space<vmem>>, vector<16x16x64xf32>
    %76 = vector.shape_cast %75 : vector<16x16x64xf32> to vector<256x64xf32>
    %77 = arith.truncf %76 : vector<256x64xf32> to vector<256x64xbf16>
    %c3 = arith.constant 3 : index
    %c0_38 = arith.constant 0 : index
    %c0_39 = arith.constant 0 : index
    %78 = vector.load %arg2[%c3, %c0_38, %c0_39] : memref<9x64x64xbf16, #tpu.memory_space<vmem>>, vector<1x64x64xbf16>
    %79 = vector.shape_cast %78 : vector<1x64x64xbf16> to vector<64x64xbf16>
    %cst_40 = arith.constant dense<0.000000e+00> : vector<256x64xf32>
    %80 = tpu.matmul %77, %79, %cst_40 {dimension_numbers = #tpu.dot_dimension_numbers<[1], [0], [0], [1], [0, 0, 1, 1], [], []>} : vector<256x64xbf16>, vector<64x64xbf16>, vector<256x64xf32> -> vector<256x64xf32>
    %81 = arith.addf %74, %80 : vector<256x64xf32>
    %c1_41 = arith.constant 1 : index
    %c1_42 = arith.constant 1 : index
    %c0_43 = arith.constant 0 : index
    %82 = vector.load %arg8[%c1_41, %c1_42, %c0_43] : memref<18x18x64xf32, #tpu.memory_space<vmem>>, vector<16x16x64xf32>
    %83 = vector.shape_cast %82 : vector<16x16x64xf32> to vector<256x64xf32>
    %84 = arith.truncf %83 : vector<256x64xf32> to vector<256x64xbf16>
    %c4 = arith.constant 4 : index
    %c0_44 = arith.constant 0 : index
    %c0_45 = arith.constant 0 : index
    %85 = vector.load %arg2[%c4, %c0_44, %c0_45] : memref<9x64x64xbf16, #tpu.memory_space<vmem>>, vector<1x64x64xbf16>
    %86 = vector.shape_cast %85 : vector<1x64x64xbf16> to vector<64x64xbf16>
    %cst_46 = arith.constant dense<0.000000e+00> : vector<256x64xf32>
    %87 = tpu.matmul %84, %86, %cst_46 {dimension_numbers = #tpu.dot_dimension_numbers<[1], [0], [0], [1], [0, 0, 1, 1], [], []>} : vector<256x64xbf16>, vector<64x64xbf16>, vector<256x64xf32> -> vector<256x64xf32>
    %88 = arith.addf %81, %87 : vector<256x64xf32>
    %c1_47 = arith.constant 1 : index
    %c2_48 = arith.constant 2 : index
    %c0_49 = arith.constant 0 : index
    %89 = vector.load %arg8[%c1_47, %c2_48, %c0_49] : memref<18x18x64xf32, #tpu.memory_space<vmem>>, vector<16x16x64xf32>
    %90 = vector.shape_cast %89 : vector<16x16x64xf32> to vector<256x64xf32>
    %91 = arith.truncf %90 : vector<256x64xf32> to vector<256x64xbf16>
    %c5 = arith.constant 5 : index
    %c0_50 = arith.constant 0 : index
    %c0_51 = arith.constant 0 : index
    %92 = vector.load %arg2[%c5, %c0_50, %c0_51] : memref<9x64x64xbf16, #tpu.memory_space<vmem>>, vector<1x64x64xbf16>
    %93 = vector.shape_cast %92 : vector<1x64x64xbf16> to vector<64x64xbf16>
    %cst_52 = arith.constant dense<0.000000e+00> : vector<256x64xf32>
    %94 = tpu.matmul %91, %93, %cst_52 {dimension_numbers = #tpu.dot_dimension_numbers<[1], [0], [0], [1], [0, 0, 1, 1], [], []>} : vector<256x64xbf16>, vector<64x64xbf16>, vector<256x64xf32> -> vector<256x64xf32>
    %95 = arith.addf %88, %94 : vector<256x64xf32>
    %c2_53 = arith.constant 2 : index
    %c0_54 = arith.constant 0 : index
    %c0_55 = arith.constant 0 : index
    %96 = vector.load %arg8[%c2_53, %c0_54, %c0_55] : memref<18x18x64xf32, #tpu.memory_space<vmem>>, vector<16x16x64xf32>
    %97 = vector.shape_cast %96 : vector<16x16x64xf32> to vector<256x64xf32>
    %98 = arith.truncf %97 : vector<256x64xf32> to vector<256x64xbf16>
    %c6 = arith.constant 6 : index
    %c0_56 = arith.constant 0 : index
    %c0_57 = arith.constant 0 : index
    %99 = vector.load %arg2[%c6, %c0_56, %c0_57] : memref<9x64x64xbf16, #tpu.memory_space<vmem>>, vector<1x64x64xbf16>
    %100 = vector.shape_cast %99 : vector<1x64x64xbf16> to vector<64x64xbf16>
    %cst_58 = arith.constant dense<0.000000e+00> : vector<256x64xf32>
    %101 = tpu.matmul %98, %100, %cst_58 {dimension_numbers = #tpu.dot_dimension_numbers<[1], [0], [0], [1], [0, 0, 1, 1], [], []>} : vector<256x64xbf16>, vector<64x64xbf16>, vector<256x64xf32> -> vector<256x64xf32>
    %102 = arith.addf %95, %101 : vector<256x64xf32>
    %c2_59 = arith.constant 2 : index
    %c1_60 = arith.constant 1 : index
    %c0_61 = arith.constant 0 : index
    %103 = vector.load %arg8[%c2_59, %c1_60, %c0_61] : memref<18x18x64xf32, #tpu.memory_space<vmem>>, vector<16x16x64xf32>
    %104 = vector.shape_cast %103 : vector<16x16x64xf32> to vector<256x64xf32>
    %105 = arith.truncf %104 : vector<256x64xf32> to vector<256x64xbf16>
    %c7 = arith.constant 7 : index
    %c0_62 = arith.constant 0 : index
    %c0_63 = arith.constant 0 : index
    %106 = vector.load %arg2[%c7, %c0_62, %c0_63] : memref<9x64x64xbf16, #tpu.memory_space<vmem>>, vector<1x64x64xbf16>
    %107 = vector.shape_cast %106 : vector<1x64x64xbf16> to vector<64x64xbf16>
    %cst_64 = arith.constant dense<0.000000e+00> : vector<256x64xf32>
    %108 = tpu.matmul %105, %107, %cst_64 {dimension_numbers = #tpu.dot_dimension_numbers<[1], [0], [0], [1], [0, 0, 1, 1], [], []>} : vector<256x64xbf16>, vector<64x64xbf16>, vector<256x64xf32> -> vector<256x64xf32>
    %109 = arith.addf %102, %108 : vector<256x64xf32>
    %c2_65 = arith.constant 2 : index
    %c2_66 = arith.constant 2 : index
    %c0_67 = arith.constant 0 : index
    %110 = vector.load %arg8[%c2_65, %c2_66, %c0_67] : memref<18x18x64xf32, #tpu.memory_space<vmem>>, vector<16x16x64xf32>
    %111 = vector.shape_cast %110 : vector<16x16x64xf32> to vector<256x64xf32>
    %112 = arith.truncf %111 : vector<256x64xf32> to vector<256x64xbf16>
    %c8 = arith.constant 8 : index
    %c0_68 = arith.constant 0 : index
    %c0_69 = arith.constant 0 : index
    %113 = vector.load %arg2[%c8, %c0_68, %c0_69] : memref<9x64x64xbf16, #tpu.memory_space<vmem>>, vector<1x64x64xbf16>
    %114 = vector.shape_cast %113 : vector<1x64x64xbf16> to vector<64x64xbf16>
    %cst_70 = arith.constant dense<0.000000e+00> : vector<256x64xf32>
    %115 = tpu.matmul %112, %114, %cst_70 {dimension_numbers = #tpu.dot_dimension_numbers<[1], [0], [0], [1], [0, 0, 1, 1], [], []>} : vector<256x64xbf16>, vector<64x64xbf16>, vector<256x64xf32> -> vector<256x64xf32>
    %116 = arith.addf %109, %115 : vector<256x64xf32>
    %c0_71 = arith.constant 0 : index
    %c0_72 = arith.constant 0 : index
    %117 = vector.load %arg3[%c0_71, %c0_72] : memref<1x64xf32, #tpu.memory_space<vmem>>, vector<1x64xf32>
    %118 = vector.broadcast %117 : vector<1x64xf32> to vector<256x64xf32>
    %119 = arith.addf %116, %118 : vector<256x64xf32>
    %cst_73 = arith.constant 0.000000e+00 : f32
    %120 = vector.broadcast %cst_73 : f32 to vector<256x64xf32>
    %121 = arith.maximumf %119, %120 : vector<256x64xf32>
    %c0_74 = arith.constant 0 : index
    %c0_75 = arith.constant 0 : index
    %122 = vector.load %arg4[%c0_74, %c0_75] : memref<4x256xf32, #tpu.memory_space<vmem>>, vector<4x256xf32>
    %cst_76 = arith.constant dense<0.000000e+00> : vector<4x64xf32>
    %123 = tpu.matmul %122, %121, %cst_76 {dimension_numbers = #tpu.dot_dimension_numbers<[1], [0], [0], [1], [0, 0, 1, 1], [], []>} : vector<4x256xf32>, vector<256x64xf32>, vector<4x64xf32> -> vector<4x64xf32>
    %124 = arith.truncf %123 : vector<4x64xf32> to vector<4x64xbf16>
    %c0_77 = arith.constant 0 : index
    %c0_78 = arith.constant 0 : index
    %125 = vector.load %arg5[%c0_77, %c0_78] : memref<64x512xbf16, #tpu.memory_space<vmem>>, vector<64x512xbf16>
    %cst_79 = arith.constant dense<0.000000e+00> : vector<4x512xf32>
    %126 = tpu.matmul %124, %125, %cst_79 {dimension_numbers = #tpu.dot_dimension_numbers<[1], [0], [0], [1], [0, 0, 1, 1], [], []>} : vector<4x64xbf16>, vector<64x512xbf16>, vector<4x512xf32> -> vector<4x512xf32>
    %c0_80 = arith.constant 0 : index
    %c0_81 = arith.constant 0 : index
    %127 = vector.load %arg6[%c0_80, %c0_81] : memref<1x512xf32, #tpu.memory_space<vmem>>, vector<1x512xf32>
    %128 = vector.broadcast %127 : vector<1x512xf32> to vector<4x512xf32>
    %129 = arith.addf %126, %128 : vector<4x512xf32>
    %cst_82 = arith.constant 0.000000e+00 : f32
    %130 = vector.broadcast %cst_82 : f32 to vector<4x512xf32>
    %131 = arith.maximumf %129, %130 : vector<4x512xf32>
    %c0_83 = arith.constant 0 : index
    %c0_84 = arith.constant 0 : index
    %c0_85 = arith.constant 0 : index
    %132 = vector.load %arg7[%c0_83, %c0_84, %c0_85] : memref<1x4x512xf32, #tpu.memory_space<vmem>>, vector<1x4x512xf32>
    %133 = vector.shape_cast %132 : vector<1x4x512xf32> to vector<4x512xf32>
    %134 = vector.shape_cast %131 : vector<4x512xf32> to vector<1x4x512xf32>
    tpu.vector_store %arg7[%c0_83, %c0_84, %c0_85], %134 {strides = array<i32>} : memref<1x4x512xf32, #tpu.memory_space<vmem>>, vector<1x4x512xf32>,
    return
  }
  func.func @transform_0(%arg0: i32) -> (i32, i32, i32) {
    %c0_i32 = arith.constant 0 : i32
    %c0_i32_0 = arith.constant 0 : i32
    %c0_i32_1 = arith.constant 0 : i32
    return %arg0, %c0_i32, %c0_i32_0 : i32, i32, i32
  }
  func.func @transform_1(%arg0: i32) -> (i32, i32, i32) {
    %c0_i32 = arith.constant 0 : i32
    %c0_i32_0 = arith.constant 0 : i32
    %c0_i32_1 = arith.constant 0 : i32
    %c0_i32_2 = arith.constant 0 : i32
    return %c0_i32, %c0_i32_0, %c0_i32_1 : i32, i32, i32
  }
  func.func @transform_2(%arg0: i32) -> (i32, i32) {
    %c0_i32 = arith.constant 0 : i32
    %c0_i32_0 = arith.constant 0 : i32
    %c0_i32_1 = arith.constant 0 : i32
    return %c0_i32, %c0_i32_0 : i32, i32
  }
  func.func @transform_3(%arg0: i32) -> (i32, i32) {
    %c0_i32 = arith.constant 0 : i32
    %c0_i32_0 = arith.constant 0 : i32
    %c0_i32_1 = arith.constant 0 : i32
    return %c0_i32, %c0_i32_0 : i32, i32
  }
  func.func @transform_4(%arg0: i32) -> (i32, i32) {
    %c0_i32 = arith.constant 0 : i32
    %c0_i32_0 = arith.constant 0 : i32
    %c0_i32_1 = arith.constant 0 : i32
    return %c0_i32, %c0_i32_0 : i32, i32
  }
  func.func @transform_5(%arg0: i32) -> (i32, i32) {
    %c0_i32 = arith.constant 0 : i32
    %c0_i32_0 = arith.constant 0 : i32
    %c0_i32_1 = arith.constant 0 : i32
    return %c0_i32, %c0_i32_0 : i32, i32
  }
  func.func @transform_6(%arg0: i32) -> (i32, i32, i32) {
    %c0_i32 = arith.constant 0 : i32
    %c0_i32_0 = arith.constant 0 : i32
    %c0_i32_1 = arith.constant 0 : i32
    return %arg0, %c0_i32, %c0_i32_0 : i32, i32, i32
  }
}

</mosaic_0001>

<bundles_post_ra>
// kernel: transnet_forward.1
= control target key start
LH: loop header
LB: loop body
LE: loop exit
PB: predicated region body
PF: predicated region fallthrough
CT: control target
= control target key end

     0   :  { %s5174_s21 = smov 0   ;;  %s6040_s0 = inlined_call_operand.vmem [shape: f32[2,3,64], index: 0, kind: input, shape index: {}]   ;;  %s6041_s1 = inlined_call_operand.vmem [shape: bf16[9,64,64], index: 1, kind: input, shape index: {}]   ;;  %s6042_s2 = inlined_call_operand.vmem [shape: f32[1,64], index: 2, kind: input, shape index: {}]   ;;  %s6043_s3 = inlined_call_operand.vmem [shape: f32[4,256], index: 3, kind: input, shape index: {}]   ;;  %s6044_s4 = inlined_call_operand.vmem [shape: bf16[64,512], index: 4, kind: input, shape index: {}]   ;;  %s6045_s5 = inlined_call_operand.vmem [shape: f32[1,512], index: 5, kind: input, shape index: {}]   ;;  %s6046_s6 = inlined_call_operand.vmem [shape: f32[2,4,512], index: 6, kind: output, shape index: {}]  }
   0x1 LB: > { %s3906_s22 = sadd.s32 4294967295, %s5135_s21   ;;  %p3910_p0 = scmp.ge.s32.totalorder %s5135_s21, 1  ;;  %s5135_s21 = sphi %s5174_s21, %s16_s21  }
   0x2   : > { %p211_p1 = scmp.lt.s32.totalorder %s5135_s21, 3 }
   0x4   : > { %p212_p2 = pnand %p3910_p0, %p211_p1 }
   0x5   : > { %v5056_v0 = vld [vmem:[%s6041_s1 + $0x20] sm:$0xff] (!%p212_p2)   ;;  %p240_p3 = scmp.lt.s32.totalorder (!%p212_p2), %s3906_s22, 1  ;;  %v251_v1 = vlaneseq (!%p212_p2)  ;;  %v5058_v3 = vld [vmem:[%s6041_s1 + $0x28] sm:$0xff] (!%p212_p2)   ;;  %v5060_v6 = vld [vmem:[%s6041_s1 + $0x30] sm:$0xff] (!%p212_p2)   ;;  %v5137_v59 = vmov (!%p212_p2), 1966171168  }
   0x6   : > { %215 = sbr.rel (%p212_p2) target bundleno = 1066 (0x42a), region = 44  ;;  %v5057_v2 = vld [vmem:[%s6041_s1 + $0x80] sm:$0xff] (!%p212_p2)   ;;  %4398 = vmatprep.subr.bf16.mxu1 (!%p212_p2), %v5056_v0  ;;  %v5059_v4 = vld [vmem:[%s6041_s1 + $0x88] sm:$0xff] (!%p212_p2)   ;;  %v5061_v7 = vld [vmem:[%s6041_s1 + $0x90] sm:$0xff] (!%p212_p2)   ;;  %v335_v60 = vunpack.c.l.s4 (!%p212_p2), %v5137_v59  ;;  %vm597_vm2 = vcmask (!%p212_p2), 523264   ;;  %vm600_vm3 = vcmask (!%p212_p2), 517120  }
   0x7   : > { %4399 = vmatpush3.bf16.msra.mxu1 (!%p212_p2), %v5056_v0  ;;  %4558 = vmatprep.subr.bf16.mxu0 (!%p212_p2), %v5057_v2  ;;  %v5196_v5 = vshrl.u32 (!%p212_p2), %v251_v1, 7  ;;  %v5062_v10 = vld [vmem:[%s6041_s1 + $0x38] sm:$0xff] (!%p212_p2)   ;;  %v5231_v27 = vld [vmem:[%s6041_s1] sm:$0xff] (!%p212_p2)  }
   0x8   : > { %4559 = vmatpush3.bf16.msra.mxu0 (!%p212_p2), %v5057_v2  ;;  %4400 = vmatprep.subr.bf16.mxu1 (!%p212_p2), %v5058_v3  ;;  %v5063_v17 = vld [vmem:[%s6041_s1 + $0x98] sm:$0xff] (!%p212_p2)   ;;  %v5238_v31 = vld [vmem:[%s6041_s1 + $0xa0] sm:$0xff] (!%p212_p2)   ;;  %v336_v62 = vunpack.c.0.s8 (!%p212_p2), %v335_v60 }
   0x9   : > { %4560 = vmatprep.subr.bf16.mxu0 (!%p212_p2), %v5059_v4  ;;  %v253_v8 = vadd.s32 (!%p212_p2), 8, %v5196_v5  ;;  %v5210_v9 = vadd.s32 (!%p212_p2), 16, %v5196_v5  ;;  %v3914_v11 = vadd.s32 (!%p212_p2), 4294967295, %v5196_v5  ;;  %v5218_v15 = vsub.s32 (!%p212_p2), 0, %v5196_v5 }
   0xa   : > { %v285_v16 = vsub.s32 (!%p212_p2), 1, %v5196_v5  ;;  %v295_v19 = vsub.s32 (!%p212_p2), 2, %v5196_v5  ;;  %vm315_vm0 = vcmp.ge.s32.totalorder (!%p212_p2), %v5196_v5, 1  ;;  %v5244_v1 = vsub.s32 (!%p212_p2), %v336_v62, %v5196_v5 }
   0xb   : > { %4401 = vmatpush3.bf16.msra.mxu1 (!%p212_p2), %v5058_v3  ;;  %v3915_v13 = vadd.s32 (!%p212_p2), 4294967295, %v253_v8  ;;  %v3916_v14 = vadd.s32 (!%p212_p2), 4294967295, %v5210_v9  ;;  %v258_v18 = vcvt.s32.f32 (!%p212_p2), %v3914_v11  ;;  %vm320_vm1 = vcmp.le.s32.totalorder (!%p212_p2), %v5210_v9, 16 }
   0xc   : > { %4561 = vmatpush3.bf16.msra.mxu0 (!%p212_p2), %v5059_v4  ;;  %4402 = vmatprep.subr.bf16.mxu1 (!%p212_p2), %v5060_v6 }
   0xd   : > { %s6048_s22 = smov (!%p240_p3, %s3906_s22), 1  ;;  %4562 = vmatprep.subr.bf16.mxu0 %v5061_v7  ;;  %v259_v20 = vcvt.s32.f32 %v3915_v13  ;;  %v260_v21 = vcvt.s32.f32 %v3916_v14 }
   0xe   : > { %s3911_s9 = sshll.u32 %s6048_s22, 2  ;;  %s4182_s27 = sshll.u32 %s6048_s22, 4 }
   0xf   : > { %s243_s14 = scalar_lea.vmem %s6040_s0, %s3911_s9  ;;  %4403 = vmatpush3.bf16.msra.mxu1 %v5060_v6  ;;  %s248_s30 = scalar_lea.vmem %s6046_s6, %s4182_s27 }
  0x10   : > { %v250_v12 = vld [vmem:[%s243_s14] sm:$0x7]  ;;  %4563 = vmatpush3.bf16.msra.mxu0 %v5061_v7  ;;  %4404 = vmatprep.subr.bf16.mxu1 %v5062_v10 }
  0x11   : > { %v264_v22 = vrot.slane %v250_v12, %v5218_v15  ;;  %v286_v23 = vrot.slane %v250_v12, %v285_v16  ;;  %4564 = vmatprep.subr.bf16.mxu0 %v5063_v17  ;;  %v296_v29 = vrot.slane %v250_v12, %v295_v19 }
  0x13   : > { %v265_v24 = vsub.f32 %v258_v18, %v264_v22  ;;  %v266_v25 = vsub.f32 %v259_v20, %v264_v22  ;;  %v267_v26 = vsub.f32 %v260_v21, %v264_v22  ;;  %v287_v28 = vsub.f32 %v258_v18, %v286_v23  ;;  %4405 = vmatpush3.bf16.msra.mxu1 %v5062_v10 }
  0x14   : > { %v288_v30 = vsub.f32 %v259_v20, %v286_v23  ;;  %v289_v32 = vsub.f32 %v260_v21, %v286_v23  ;;  %4565 = vmatpush3.bf16.msra.mxu0 %v5063_v17  ;;  %4438 = vmatprep.subr.bf16.mxu1 %v5231_v27 }
  0x15   : > { %v268_v33 = vmul.f32 %v265_v24, %v265_v24  ;;  %v269_v34 = vmul.f32 %v266_v25, %v266_v25  ;;  %v270_v35 = vmul.f32 %v267_v26, %v267_v26  ;;  %v290_v36 = vmul.f32 %v287_v28, %v287_v28  ;;  %4598 = vmatprep.subr.bf16.mxu0 %v5238_v31 }
  0x16   : > { %v291_v37 = vmul.f32 %v288_v30, %v288_v30  ;;  %v292_v38 = vmul.f32 %v289_v32, %v289_v32 }
  0x17   : > { %v271_v39 = vsub.f32 0.0, %v268_v33  ;;  %v272_v40 = vsub.f32 0.0, %v269_v34  ;;  %v273_v41 = vsub.f32 0.0, %v270_v35  ;;  %v297_v42 = vadd.f32 %v296_v29, %v290_v36 }
  0x18   : > { %v298_v43 = vadd.f32 %v296_v29, %v291_v37  ;;  %v299_v44 = vadd.f32 %v296_v29, %v292_v38 }
  0x19   : > { %v274_v45 = vmul.f32 0.08, %v271_v39  ;;  %v276_v46 = vmul.f32 0.08, %v273_v41  ;;  %v300_v47 = vsub.f32 0.0, %v297_v42 }
  0x1a   : > { %v301_v48 = vsub.f32 0.0, %v298_v43  ;;  %v302_v49 = vsub.f32 0.0, %v299_v44  ;;  %v275_v50 = vmul.f32 0.08, %v272_v40 }
  0x1b   : > { %v277_v51 = vmul.f32 1.442695, %v274_v45  ;;  %v281_v52 = vmul.f32 1.442695, %v276_v46  ;;  %v303_v53 = vmul.f32 0.08, %v300_v47 }
  0x1c   : > { %v304_v54 = vmul.f32 0.08, %v301_v48  ;;  %v305_v55 = vmul.f32 0.08, %v302_v49  ;;  %v279_v61 = vmul.f32 1.442695, %v275_v50 }
  0x1d   : > { %v306_v56 = vmul.f32 1.442695, %v303_v53  ;;  %5117 = vpow2.f32 %v277_v51 }
  0x1e   : > { %v308_v57 = vmul.f32 1.442695, %v304_v54  ;;  %v310_v58 = vmul.f32 1.442695, %v305_v55 }
  0x1f   : > { %5119 = vpow2.f32 %v306_v56 }
  0x20   : > { %5121 = vpow2.f32 %v308_v57 }
  0x21   : > { %5123 = vpow2.f32 %v310_v58 }
  0x22   : > { %5125 = vpow2.f32 %v281_v52 }
  0x23   : > { %5127 = vpow2.f32 %v279_v61 }
  0x27   : > { %v5118_v63 = vpop.eup %5117 }
  0x28   : > { %v5249_v17 = vsel %vm315_vm0, %v5118_v63, 0.0 }
  0x29   : > { %v5120_v0 = vpop.eup %5119 }
  0x2a   : > { %v5122_v2 = vpop.eup %5121  ;;  %v312_v3 = vmul.f32 255.0, %v5120_v0 }
  0x2b   : > { %v5124_v4 = vpop.eup %5123  ;;  %v313_v6 = vmul.f32 255.0, %v5122_v2 }
  0x2c   : > { %v327_v7 = vsel %vm315_vm0, %v312_v3, 0.0  ;;  %v314_v8 = vmul.f32 255.0, %v5124_v4  ;;  %v5126_v10 = vpop.eup %5125 }
  0x2d   : > { %v333_v11 = vcombine.high %v327_v7, %v327_v7  ;;  %v340_v12 = vrot.slane %v327_v7, %v5244_v1  ;;  %v389_v13 = vrot.slane %v313_v6, %v5244_v1  ;;  %v382_v14 = vcombine.high %v313_v6, %v313_v6  ;;  %v5256_v23 = vpop.eup %5127 }
  0x2e   : > { %v5260_v24 = vsel %vm320_vm1, %v5126_v10, 0.0  ;;  %v5267_v28 = vsel %vm320_vm1, %v314_v8, 0.0 }
  0x2f   : > { %v347_v18 = vrot.slane %v333_v11, %v5244_v1  ;;  %v348_v20 = vcombine.high %v340_v12, %v340_v12  ;;  %v356_v21 = vrot.slane %v340_v12, %v5244_v1  ;;  %v5254_v22 = vrot.slane %v389_v13, %v5244_v1 }
  0x30   : > { %v397_v25 = vcombine.high %v389_v13, %v389_v13  ;;  %v5263_v26 = vrot.slane %v382_v14, %v5244_v1 }
  0x31   : > { %v378_v29 = vcombine.high %v356_v21, %v356_v21  ;;  %v456_v30 = vrot.slane %v356_v21, %v5218_v15  ;;  %v370_v32 = vrot.slane %v348_v20, %v5244_v1  ;;  %v363_v33 = vrot.slane %v347_v18, %v5244_v1 }
  0x32   : > { %v349_v34 = vcombine.high %v347_v18, %v347_v18  ;;  %v488_v35 = vrot.slane %v5254_v22, %v5218_v15  ;;  %v5275_v36 = vrot.slane %v397_v25, %v5244_v1  ;;  %v427_v37 = vcombine.high %v5254_v22, %v5254_v22 }
  0x33   : > { %v543_v9 = vmul.f32 %v456_v30, %v5249_v17  ;;  %v544_v38 = vmul.f32 %v5256_v23, %v456_v30  ;;  %v545_v39 = vmul.f32 %v456_v30, %v5260_v24  ;;  %v460_v40 = vrot.slane %v370_v32, %v5218_v15 }
  0x34   : > { %v464_v41 = vrot.slane %v378_v29, %v5218_v15  ;;  %v380_v42 = vcombine.high %v370_v32, %v370_v32  ;;  %v472_v43 = vrot.slane %v363_v33, %v5218_v15  ;;  %v377_v44 = vrot.slane %v349_v34, %v5244_v1 }
  0x35   : > { %598 = vst.msk [vmem:[#allocation2] sm:$0xff] %vm597_vm2, %v543_v9  ;;  %599 = vst.msk [vmem:[#allocation2 + $0x8] sm:$0xff] %vm597_vm2, %v544_v38  ;;  %v546_v45 = vmul.f32 %v460_v40, %v5249_v17  ;;  %v547_v46 = vmul.f32 %v5256_v23, %v460_v40  ;;  %v548_v47 = vmul.f32 %v460_v40, %v5260_v24 }
  0x36   : > { %601 = vst.msk [vmem:[#allocation2 + $0x10] sm:$0x3] %vm600_vm3, %v545_v39  ;;  %v379_v48 = vcombine.high %v363_v33, %v363_v33  ;;  %v549_v49 = vmul.f32 %v464_v41, %v5249_v17  ;;  %v550_v50 = vmul.f32 %v5256_v23, %v464_v41  ;;  %v551_v51 = vmul.f32 %v464_v41, %v5260_v24 }
  0x37   : > { %v468_v52 = vrot.slane %v380_v42, %v5218_v15  ;;  %602 = vst.msk [vmem:[#allocation2 + $0x18] sm:$0xff] %vm597_vm2, %v546_v45  ;;  %603 = vst.msk [vmem:[#allocation2 + $0x20] sm:$0xff] %vm597_vm2, %v547_v46  ;;  %v555_v53 = vmul.f32 %v472_v43, %v5249_v17  ;;  %v556_v54 = vmul.f32 %v5256_v23, %v472_v43 }
  0x38   : > { %604 = vst.msk [vmem:[#allocation2 + $0x28] sm:$0x3] %vm600_vm3, %v548_v47  ;;  %v557_v55 = vmul.f32 %v472_v43, %v5260_v24  ;;  %v476_v56 = vrot.slane %v377_v44, %v5218_v15  ;;  %607 = vst.msk [vmem:[#allocation2 + $0x40] sm:$0x3] %vm600_vm3, %v551_v51  ;;  %v480_v60 = vrot.slane %v379_v48, %v5218_v15 }
  0x39   : > { %605 = vst.msk [vmem:[#allocation2 + $0x30] sm:$0xff] %vm597_vm2, %v549_v49  ;;  %606 = vst.msk [vmem:[#allocation2 + $0x38] sm:$0xff] %vm597_vm2, %v550_v50  ;;  %v552_v57 = vmul.f32 %v468_v52, %v5249_v17  ;;  %v553_v58 = vmul.f32 %v5256_v23, %v468_v52  ;;  %v554_v59 = vmul.f32 %v468_v52, %v5260_v24  ;;  %v5066_v50 = vld [vmem:[%s6041_s1 + $0xa8] sm:$0xff]  }
  0x3a   : > { %611 = vst.msk [vmem:[#allocation2 + $0x60] sm:$0xff] %vm597_vm2, %v555_v53  ;;  %612 = vst.msk [vmem:[#allocation2 + $0x68] sm:$0xff] %vm597_vm2, %v556_v54  ;;  %v558_v61 = vmul.f32 %v476_v56, %v5249_v17  ;;  %v559_v62 = vmul.f32 %v5256_v23, %v476_v56  ;;  %v560_v63 = vmul.f32 %v476_v56, %v5260_v24  ;;  %v5067_v56 = vld [vmem:[%s6041_s1 + $0x8] sm:$0xff]  }
  0x3b   : > { %613 = vst.msk [vmem:[#allocation2 + $0x70] sm:$0x3] %vm600_vm3, %v557_v55  ;;  %v381_v0 = vcombine.high %v377_v44, %v377_v44  ;;  %610 = vst.msk [vmem:[#allocation2 + $0x58] sm:$0x3] %vm600_vm3, %v554_v59  ;;  %v561_v2 = vmul.f32 %v480_v60, %v5249_v17  ;;  %v562_v3 = vmul.f32 %v5256_v23, %v480_v60 }
  0x3c   : > { %608 = vst.msk [vmem:[#allocation2 + $0x48] sm:$0xff] %vm597_vm2, %v552_v57  ;;  %609 = vst.msk [vmem:[#allocation2 + $0x50] sm:$0xff] %vm597_vm2, %v553_v58  ;;  %v563_v4 = vmul.f32 %v480_v60, %v5260_v24  ;;  %v567_v6 = vmul.f32 %v488_v35, %v5249_v17  ;;  %v568_v8 = vmul.f32 %v5256_v23, %v488_v35  ;;  %v709_v12 = vld [vmem:[#allocation2 + $0x1] sm:$0xff] }
  0x3d   : > { %614 = vst.msk [vmem:[#allocation2 + $0x78] sm:$0xff] %vm597_vm2, %v558_v61  ;;  %615 = vst.msk [vmem:[#allocation2 + $0x80] sm:$0xff] %vm597_vm2, %v559_v62  ;;  %v484_v7 = vrot.slane %v381_v0, %v5218_v15  ;;  %v569_v10 = vmul.f32 %v488_v35, %v5260_v24  ;;  %v492_v11 = vrot.slane %v5275_v36, %v5218_v15  ;;  %v710_v13 = vld [vmem:[#allocation2 + $0x9] sm:$0xff] }
  0x3e   : > { %616 = vst.msk [vmem:[#allocation2 + $0x88] sm:$0x3] %vm600_vm3, %v560_v63  ;;  %619 = vst.msk [vmem:[#allocation2 + $0xa0] sm:$0x3] %vm600_vm3, %v563_v4  ;;  %v496_v14 = vrot.slane %v427_v37, %v5218_v15  ;;  %v429_v18 = vcombine.high %v5275_v36, %v5275_v36  ;;  %v5340_v20 = vrot.slane %v5263_v26, %v5244_v1  ;;  %v711_v32 = vld [vmem:[#allocation2 + $0x19] sm:$0xff]  ;;  %v5068_v4 = vld [vmem:[%s6041_s1 + $0x10] sm:$0xff]  }
  0x3f   : > { %617 = vst.msk [vmem:[#allocation2 + $0x90] sm:$0xff] %vm597_vm2, %v561_v2  ;;  %618 = vst.msk [vmem:[#allocation2 + $0x98] sm:$0xff] %vm597_vm2, %v562_v3  ;;  %v398_v21 = vcombine.high %v5263_v26, %v5263_v26  ;;  %v741_v22 = vpack.c.bf16 %v710_v13, %v709_v12  ;;  %v564_v25 = vmul.f32 %v484_v7, %v5249_v17  ;;  %v712_v33 = vld [vmem:[#allocation2 + $0x21] sm:$0xff]  ;;  %v5069_v12 = vld [vmem:[%s6041_s1 + $0xb0] sm:$0xff]  }
  0x40   : > { %623 = vst.msk [vmem:[#allocation2 + $0xc0] sm:$0xff] %vm597_vm2, %v567_v6  ;;  %v565_v29 = vmul.f32 %v5256_v23, %v484_v7  ;;  %v566_v30 = vmul.f32 %v484_v7, %v5260_v24  ;;  %624 = vst.msk [vmem:[#allocation2 + $0xc8] sm:$0xff] %vm597_vm2, %v568_v8  ;;  %v570_v34 = vmul.f32 %v492_v11, %v5249_v17  ;;  %v1879_v9 = vld [vmem:[#allocation2 + $0x31] sm:$0xff]  ;;  %v1880_v38 = vld [vmem:[#allocation2 + $0x39] sm:$0xff] }
  0x41   : > { %625 = vst.msk [vmem:[#allocation2 + $0xd0] sm:$0x3] %vm600_vm3, %v569_v10  ;;  %v571_v35 = vmul.f32 %v5256_v23, %v492_v11  ;;  %v572_v36 = vmul.f32 %v492_v11, %v5260_v24  ;;  %v573_v26 = vmul.f32 %v496_v14, %v5249_v17  ;;  %4406 = vmatprep.mubr.msk.bf16.mxu1 %vm597_vm2, %v741_v22  ;;  %v1883_v52 = vld [vmem:[#allocation2 + $0x61] sm:$0xff]  ;;  %v5071_v22 = vld [vmem:[%s6041_s1 + $0xb8] sm:$0xff]  }
  0x42   : > { %v742_v37 = vpack.c.bf16 %v712_v33, %v711_v32  ;;  %620 = vst.msk [vmem:[#allocation2 + $0xa8] sm:$0xff] %vm597_vm2, %v564_v25  ;;  %621 = vst.msk [vmem:[#allocation2 + $0xb0] sm:$0xff] %vm597_vm2, %v565_v29  ;;  %v574_v39 = vmul.f32 %v5256_v23, %v496_v14  ;;  %v575_v40 = vmul.f32 %v496_v14, %v5260_v24  ;;  %v1884_v53 = vld [vmem:[#allocation2 + $0x69] sm:$0xff] }
  0x43   : > { %622 = vst.msk [vmem:[#allocation2 + $0xb8] sm:$0x3] %vm600_vm3, %v566_v30  ;;  %v500_v41 = vrot.slane %v429_v18, %v5218_v15  ;;  %v1910_v42 = vpack.c.bf16 %v1880_v38, %v1879_v9  ;;  %628 = vst.msk [vmem:[#allocation2 + $0xe8] sm:$0x3] %vm600_vm3, %v572_v36  ;;  %v504_v43 = vrot.slane %v5340_v20, %v5218_v15  ;;  %v715_v46 = vld [vmem:[#allocation2 + $0x49] sm:$0xff]  ;;  %v716_v47 = vld [vmem:[#allocation2 + $0x51] sm:$0xff] }
  0x44   : > { %626 = vst.msk [vmem:[#allocation2 + $0xd8] sm:$0xff] %vm597_vm2, %v570_v34  ;;  %627 = vst.msk [vmem:[#allocation2 + $0xe0] sm:$0xff] %vm597_vm2, %v571_v35  ;;  %v426_v44 = vrot.slane %v398_v21, %v5244_v1  ;;  %v428_v45 = vcombine.high %v5340_v20, %v5340_v20  ;;  %4407 = vmatmul.mubr.msk.bf16.vlgmr.msra.gmra.mrb[0].mxu1 %vm597_vm2, %v742_v37  ;;  %4566 = vmatprep.mubr.msk.bf16.mxu0 %vm597_vm2, %v742_v37  ;;  %v719_v61 = vld [vmem:[#allocation2 + $0x79] sm:$0xff] }
  0x45   : > { %629 = vst.msk [vmem:[#allocation2 + $0xf0] sm:$0xff] %vm597_vm2, %v573_v26  ;;  %630 = vst.msk [vmem:[#allocation2 + $0xf8] sm:$0xff] %vm597_vm2, %v574_v39  ;;  %v576_v48 = vmul.f32 %v500_v41, %v5249_v17  ;;  %v577_v49 = vmul.f32 %v5256_v23, %v500_v41  ;;  %4567 = vmatmul.mubr.msk.bf16.vlgmr.msra.gmra.mrb[0].mxu0 %vm597_vm2, %v1910_v42  ;;  %4410 = vmatprep.mubr.msk.bf16.mxu1 %vm597_vm2, %v1910_v42  ;;  %v720_v62 = vld [vmem:[#allocation2 + $0x81] sm:$0xff]  ;;  %v5070_v21 = vld [vmem:[%s6041_s1 + $0x18] sm:$0xff]  }
  0x46   : > { %631 = vst.msk [vmem:[#allocation2 + $0x100] sm:$0x3] %vm600_vm3, %v575_v40  ;;  %v744_v51 = vpack.c.bf16 %v716_v47, %v715_v46  ;;  %v578_v54 = vmul.f32 %v500_v41, %v5260_v24  ;;  %v579_v55 = vmul.f32 %v504_v43, %v5249_v17  ;;  %4599 = vmatpush3.bf16.msra.mxu0 %v5238_v31  ;;  %v1887_v25 = vld [vmem:[#allocation2 + $0x91] sm:$0xff]  ;;  %v1888_v29 = vld [vmem:[#allocation2 + $0x99] sm:$0xff] }
  0x47   : > { %632 = vst.msk [vmem:[#allocation2 + $0x108] sm:$0xff] %vm597_vm2, %v576_v48  ;;  %633 = vst.msk [vmem:[#allocation2 + $0x110] sm:$0xff] %vm597_vm2, %v577_v49  ;;  %v580_v57 = vmul.f32 %v5256_v23, %v504_v43  ;;  %v581_v58 = vmul.f32 %v504_v43, %v5260_v24  ;;  %v508_v59 = vrot.slane %v426_v44, %v5218_v15  ;;  %4439 = vmatpush3.bf16.msra.mxu1 %v5231_v27  ;;  %v5449_v36 = vld [vmem:[%s6041_s1 + $0xc0] sm:$0xff]  }
  0x48   : > { %v5393_v60 = vrot.slane %v5267_v28, %v5244_v1  ;;  %4570 = vmatprep.mubr.msk.bf16.mxu0 %vm597_vm2, %v744_v51  ;;  %634 = vst.msk [vmem:[#allocation2 + $0x118] sm:$0x3] %vm600_vm3, %v578_v54  ;;  %v512_v31 = vrot.slane %v428_v45, %v5218_v15  ;;  %v430_v63 = vcombine.high %v426_v44, %v426_v44  ;;  %v5454_v9 = vld [vmem:[%s6041_s1 + $0x40] sm:$0xff]   ;;  %v1892_v39 = vld [vmem:[#allocation2 + $0xc9] sm:$0xff] }
  0x49   : > { %635 = vst.msk [vmem:[#allocation2 + $0x120] sm:$0xff] %vm597_vm2, %v579_v55  ;;  %v1912_v0 = vpack.c.bf16 %v1884_v53, %v1883_v52  ;;  %636 = vst.msk [vmem:[#allocation2 + $0x128] sm:$0xff] %vm597_vm2, %v580_v57  ;;  %v582_v28 = vmul.f32 %v508_v59, %v5249_v17  ;;  %v583_v2 = vmul.f32 %v5256_v23, %v508_v59  ;;  %4600 = vmatprep.subr.bf16.mxu0 %v5066_v50  ;;  %v723_v34 = vld [vmem:[#allocation2 + $0xa9] sm:$0xff]  ;;  %v1891_v38 = vld [vmem:[#allocation2 + $0xc1] sm:$0xff] }
  0x4a   : > { %637 = vst.msk [vmem:[#allocation2 + $0x130] sm:$0x3] %vm600_vm3, %v581_v58  ;;  %v584_v3 = vmul.f32 %v508_v59, %v5260_v24  ;;  %v585_v27 = vmul.f32 %v512_v31, %v5249_v17  ;;  %v586_v6 = vmul.f32 %v5256_v23, %v512_v31  ;;  %v587_v7 = vmul.f32 %v512_v31, %v5260_v24  ;;  %v724_v35 = vld [vmem:[#allocation2 + $0xb1] sm:$0xff] }
  0x4b   : > { %4440 = vmatprep.subr.bf16.mxu1 %v5067_v56  ;;  %v516_v8 = vrot.slane %v430_v63, %v5218_v15  ;;  %v746_v10 = vpack.c.bf16 %v720_v62, %v719_v61  ;;  %638 = vst.msk [vmem:[#allocation2 + $0x138] sm:$0xff] %vm597_vm2, %v582_v28  ;;  %639 = vst.msk [vmem:[#allocation2 + $0x140] sm:$0xff] %vm597_vm2, %v583_v2  ;;  %4601 = vmatpush3.bf16.msra.mxu0 %v5066_v50  ;;  %v727_v40 = vld [vmem:[#allocation2 + $0xd9] sm:$0xff]  ;;  %v728_v41 = vld [vmem:[#allocation2 + $0xe1] sm:$0xff] }
  0x4c   : > { %640 = vst.msk [vmem:[#allocation2 + $0x148] sm:$0x3] %vm600_vm3, %v584_v3  ;;  %v445_v11 = vrot.slane %v5393_v60, %v5244_v1  ;;  %643 = vst.msk [vmem:[#allocation2 + $0x160] sm:$0x3] %vm600_vm3, %v587_v7  ;;  %4441 = vmatpush3.bf16.msra.mxu1 %v5067_v56  ;;  %4602 = vmatprep.subr.bf16.mxu0 %v5069_v12  ;;  %v1914_v26 = vpack.c.bf16 %v1888_v29, %v1887_v25  ;;  %v1895_v44 = vld [vmem:[#allocation2 + $0xf1] sm:$0xff]  ;;  %v654_v3 = vld [vmem:[#allocation2 + $0x8] sm:$0xff] }
  0x4d   : > { %641 = vst.msk [vmem:[#allocation2 + $0x150] sm:$0xff] %vm597_vm2, %v585_v27  ;;  %642 = vst.msk [vmem:[#allocation2 + $0x158] sm:$0xff] %vm597_vm2, %v586_v6  ;;  %v588_v13 = vmul.f32 %v516_v8, %v5249_v17  ;;  %v589_v14 = vmul.f32 %v5256_v23, %v516_v8  ;;  %v590_v18 = vmul.f32 %v516_v8, %v5260_v24  ;;  %4411 = vmatmul.mubr.msk.bf16.gmra.mrb[4].mxu1 %vm597_vm2, %v744_v51  ;;  %v1896_v45 = vld [vmem:[#allocation2 + $0xf9] sm:$0xff] }
  0x4e   : > { %4442 = vmatprep.subr.bf16.mxu1 %v5068_v4  ;;  %v520_v20 = vrot.slane %v445_v11, %v5218_v15  ;;  %4571 = vmatmul.mubr.msk.bf16.gmra.mrb[4].mxu0 %vm597_vm2, %v1912_v0  ;;  %v748_v37 = vpack.c.bf16 %v724_v35, %v723_v34  ;;  %v1916_v42 = vpack.c.bf16 %v1892_v39, %v1891_v38  ;;  %v731_v46 = vld [vmem:[#allocation2 + $0x109] sm:$0xff]  ;;  %v655_v8 = vld [vmem:[#allocation2 + $0x18] sm:$0xff] }
  0x4f   : > { %4414 = vmatprep.mubr.msk.bf16.mxu1 %vm597_vm2, %v1912_v0  ;;  %644 = vst.msk [vmem:[#allocation2 + $0x168] sm:$0xff] %vm597_vm2, %v588_v13  ;;  %645 = vst.msk [vmem:[#allocation2 + $0x170] sm:$0xff] %vm597_vm2, %v589_v14  ;;  %4574 = vmatprep.mubr.msk.bf16.mxu0 %vm597_vm2, %v746_v10  ;;  %v750_v43 = vpack.c.bf16 %v728_v41, %v727_v40  ;;  %v732_v47 = vld [vmem:[#allocation2 + $0x111] sm:$0xff]  ;;  %v1918_v48 = vpack.c.bf16 %v1896_v45, %v1895_v44  ;;  %v2205_v35 = vld [vmem:[#allocation2 + $0x62] sm:$0xff] }
  0x50   : > { %646 = vst.msk [vmem:[#allocation2 + $0x178] sm:$0x3] %vm600_vm3, %v590_v18  ;;  %v591_v30 = vmul.f32 %v520_v20, %v5249_v17  ;;  %v592_v32 = vmul.f32 %v5256_v23, %v520_v20  ;;  %v593_v33 = vmul.f32 %v520_v20, %v5260_v24  ;;  %4443 = vmatpush3.bf16.msra.mxu1 %v5068_v4  ;;  %v1899_v50 = vld [vmem:[#allocation2 + $0x121] sm:$0xff]  ;;  %v2201_v11 = vld [vmem:[#allocation2 + $0x32] sm:$0xff]  ;;  %v2203_v18 = vld [vmem:[#allocation2 + $0x4a] sm:$0xff] }
  0x51   : > { %4603 = vmatpush3.bf16.msra.mxu0 %v5069_v12  ;;  %4444 = vmatprep.subr.bf16.mxu1 %v5070_v21  ;;  %v752_v49 = vpack.c.bf16 %v732_v47, %v731_v46  ;;  %v1900_v51 = vld [vmem:[#allocation2 + $0x129] sm:$0xff]  ;;  %v438_v56 = vcombine.high %v5393_v60, %v5393_v60  ;;  %v2202_v12 = vld [vmem:[#allocation2 + $0x3a] sm:$0xff]  ;;  %v2204_v20 = vld [vmem:[#allocation2 + $0x52] sm:$0xff] }
  0x52   : > { %647 = vst.msk [vmem:[#allocation2 + $0x180] sm:$0xff] %vm597_vm2, %v591_v30  ;;  %648 = vst.msk [vmem:[#allocation2 + $0x188] sm:$0xff] %vm597_vm2, %v592_v32  ;;  %4604 = vmatprep.subr.bf16.mxu0 %v5071_v22  ;;  %v735_v52 = vld [vmem:[#allocation2 + $0x139] sm:$0xff]  ;;  %v1920_v54 = vpack.c.bf16 %v1900_v51, %v1899_v50  ;;  %v2200_v4 = vld [vmem:[#allocation2 + $0x22] sm:$0xff]  ;;  %v5510_v29 = vpack.c.bf16 %v2204_v20, %v2203_v18 }
  0x53   : > { %649 = vst.msk [vmem:[#allocation2 + $0x190] sm:$0x3] %vm600_vm3, %v593_v33  ;;  %v736_v53 = vld [vmem:[#allocation2 + $0x141] sm:$0xff]  ;;  %v452_v57 = vrot.slane %v438_v56, %v5244_v1  ;;  %v657_v13 = vld [vmem:[#allocation2 + $0x30] sm:$0xff]  ;;  %v658_v14 = vld [vmem:[#allocation2 + $0x38] sm:$0xff] }
  0x54   : > { %4445 = vmatpush3.bf16.msra.mxu1 %v5070_v21  ;;  %v754_v55 = vpack.c.bf16 %v736_v53, %v735_v52  ;;  %v1903_v58 = vld [vmem:[#allocation2 + $0x151] sm:$0xff]  ;;  %v1904_v59 = vld [vmem:[#allocation2 + $0x159] sm:$0xff]  ;;  %v5508_v25 = vpack.c.bf16 %v658_v14, %v657_v13  ;;  %v5074_v30 = vld [vmem:[%s6041_s1 + $0xc8] sm:$0xff]  }
  0x55   : > { %4605 = vmatpush3.bf16.msra.mxu0 %v5071_v22  ;;  %4415 = vmatmul.mubr.msk.bf16.gmra.mrb[8].mxu1 %vm597_vm2, %v746_v10  ;;  %v5478_v31 = vrot.slane %v452_v57, %v5218_v15  ;;  %v1922_v63 = vpack.c.bf16 %v1904_v59, %v1903_v58  ;;  %v653_v1 = vld [vmem:[#allocation2] sm:$0xff]  ;;  %v5506_v22 = vpack.c.bf16 %v2202_v12, %v2201_v11  ;;  %v5075_v32 = vld [vmem:[%s6041_s1 + $0x48] sm:$0xff]   ;;  %v660_v34 = vld [vmem:[#allocation2 + $0x50] sm:$0xff] }
  0x56   : > { %4638 = vmatprep.subr.bf16.mxu0 %v5449_v36  ;;  %4575 = vmatmul.mubr.msk.bf16.gmra.mrb[8].mxu0 %vm597_vm2, %v1914_v26  ;;  %v739_v61 = vld [vmem:[#allocation2 + $0x169] sm:$0xff]  ;;  %v685_v6 = vpack.c.bf16 %v654_v3, %v653_v1  ;;  %v656_v10 = vld [vmem:[#allocation2 + $0x20] sm:$0xff]  ;;  %v5078_v46 = vld [vmem:[%s6041_s1 + $0x58] sm:$0xff]  }
  0x57   : > { %4418 = vmatprep.mubr.msk.bf16.mxu1 %vm597_vm2, %v1914_v26  ;;  %4578 = vmatprep.mubr.msk.bf16.mxu0 %vm597_vm2, %v748_v37  ;;  %v740_v62 = vld [vmem:[#allocation2 + $0x171] sm:$0xff]  ;;  %v594_v60 = vmul.f32 %v5478_v31, %v5249_v17  ;;  %v595_v0 = vmul.f32 %v5256_v23, %v5478_v31  ;;  %v2199_v23 = vld [vmem:[#allocation2 + $0x1a] sm:$0xff]  ;;  %v5504_v21 = vpack.c.bf16 %v656_v10, %v655_v8  ;;  %v659_v33 = vld [vmem:[#allocation2 + $0x48] sm:$0xff] }
  0x58   : > { %4478 = vmatprep.subr.bf16.mxu1 %v5454_v9  ;;  %v5484_v28 = vpack.c.bf16 %v740_v62, %v739_v61  ;;  %v5495_v7 = vpack.c.bf16 %v2200_v4, %v2199_v23  ;;  %v2206_v26 = vld [vmem:[#allocation2 + $0x6a] sm:$0xff]  ;;  %v2207_v39 = vld [vmem:[#allocation2 + $0x7a] sm:$0xff]  ;;  %v2208_v40 = vld [vmem:[#allocation2 + $0x82] sm:$0xff] }
  0x59   : > { %650 = vst.msk [vmem:[#allocation2 + $0x198] sm:$0xff] %vm597_vm2, %v594_v60  ;;  %651 = vst.msk [vmem:[#allocation2 + $0x1a0] sm:$0xff] %vm597_vm2, %v595_v0  ;;  %v1907_v17 = vld [vmem:[#allocation2 + $0x181] sm:$0xff]  ;;  %v5077_v41 = vld [vmem:[%s6041_s1 + $0xd0] sm:$0xff]   ;;  %v5536_v44 = vpack.c.bf16 %v2206_v26, %v2205_v35 }
  0x5a   : > { %v1908_v2 = vld [vmem:[#allocation2 + $0x189] sm:$0xff]  ;;  %v663_v47 = vld [vmem:[#allocation2 + $0x78] sm:$0xff]  ;;  %v5566_v57 = vld [vmem:[%s6041_s1 + $0x60] sm:$0xff]  }
  0x5b   : > { %v5493_v27 = vpack.c.bf16 %v1908_v2, %v1907_v17  ;;  %v662_v38 = vld [vmem:[#allocation2 + $0x68] sm:$0xff]  ;;  %v2210_v50 = vld [vmem:[#allocation2 + $0x9a] sm:$0xff]  ;;  %v665_v51 = vld [vmem:[#allocation2 + $0x90] sm:$0xff] }
  0x5c   : > { %v666_v52 = vld [vmem:[#allocation2 + $0x98] sm:$0xff]  ;;  %v2211_v53 = vld [vmem:[#allocation2 + $0xaa] sm:$0xff]  ;;  %v2213_v60 = vld [vmem:[#allocation2 + $0xc2] sm:$0xff] }
  0x5d   : > { %4419 = vmatmul.mubr.msk.bf16.gmra.mrb[12].mxu1 %vm597_vm2, %v748_v37  ;;  %v661_v37 = vld [vmem:[#allocation2 + $0x60] sm:$0xff]  ;;  %v5570_v59 = vpack.c.bf16 %v666_v52, %v665_v51  ;;  %v667_v62 = vld [vmem:[#allocation2 + $0xa8] sm:$0xff]  ;;  %v671_v10 = vld [vmem:[#allocation2 + $0xd8] sm:$0xff] }
  0x5e   : > { %4579 = vmatmul.mubr.msk.bf16.gmra.mrb[12].mxu0 %vm597_vm2, %v1916_v42  ;;  %4422 = vmatprep.mubr.msk.bf16.mxu1 %vm597_vm2, %v1916_v42  ;;  %v5531_v42 = vpack.c.bf16 %v660_v34, %v659_v33  ;;  %v5538_v45 = vpack.c.bf16 %v662_v38, %v661_v37  ;;  %v2214_v0 = vld [vmem:[#allocation2 + $0xca] sm:$0xff]  ;;  %v669_v1 = vld [vmem:[#allocation2 + $0xc0] sm:$0xff]  ;;  %v2217_v12 = vld [vmem:[#allocation2 + $0xf2] sm:$0xff] }
  0x5f   : > { %4582 = vmatprep.mubr.msk.bf16.mxu0 %vm597_vm2, %v750_v43  ;;  %v670_v17 = vld [vmem:[#allocation2 + $0xc8] sm:$0xff]  ;;  %v2215_v2 = vld [vmem:[#allocation2 + $0xda] sm:$0xff]  ;;  %v5586_v4 = vpack.c.bf16 %v2214_v0, %v2213_v60  ;;  %v673_v14 = vld [vmem:[#allocation2 + $0xf0] sm:$0xff] }
  0x60   : > { %v2216_v3 = vld [vmem:[#allocation2 + $0xe2] sm:$0xff]  ;;  %v2218_v13 = vld [vmem:[#allocation2 + $0xfa] sm:$0xff]  ;;  %v2219_v20 = vld [vmem:[#allocation2 + $0x10a] sm:$0xff] }
  0x61   : > { %v5590_v8 = vpack.c.bf16 %v2216_v3, %v2215_v2  ;;  %v672_v11 = vld [vmem:[#allocation2 + $0xe0] sm:$0xff]  ;;  %v674_v18 = vld [vmem:[#allocation2 + $0xf8] sm:$0xff]  ;;  %v5602_v33 = vpack.c.bf16 %v2218_v13, %v2217_v12  ;;  %v675_v26 = vld [vmem:[#allocation2 + $0x108] sm:$0xff]  ;;  %v596_v2 = vmul.f32 %v5478_v31, %v5260_v24 }
  0x62   : > { %v5604_v34 = vpack.c.bf16 %v674_v18, %v673_v14  ;;  %v676_v37 = vld [vmem:[#allocation2 + $0x110] sm:$0xff]  ;;  %v2221_v38 = vld [vmem:[#allocation2 + $0x122] sm:$0xff] }
  0x63   : > { %v680_v51 = vld [vmem:[#allocation2 + $0x140] sm:$0xff]  ;;  %v2225_v52 = vld [vmem:[#allocation2 + $0x152] sm:$0xff]  ;;  %652 = vst.msk [vmem:[#allocation2 + $0x1a8] sm:$0x3] %vm600_vm3, %v596_v2  ;;  %v2230_v31 = vld [vmem:[#allocation2 + $0x18a] sm:$0xff] }
  0x64   : > { %v2228_v60 = vld [vmem:[#allocation2 + $0x172] sm:$0xff]  ;;  %v1232_v12 = vld [vmem:[#allocation2 + $0x2] sm:$0xff]  ;;  %v1233_v13 = vld [vmem:[#allocation2 + $0xa] sm:$0xff] }
  0x65   : > { %4423 = vmatmul.mubr.msk.bf16.gmra.mrb[16].mxu1 %vm597_vm2, %v750_v43  ;;  %v5076_v43 = vld [vmem:[%s6041_s1 + $0x50] sm:$0xff]   ;;  %v2229_v24 = vld [vmem:[#allocation2 + $0x182] sm:$0xff] }
  0x66   : > { %4583 = vmatmul.mubr.msk.bf16.gmra.mrb[16].mxu0 %vm597_vm2, %v1918_v48  ;;  %4426 = vmatprep.mubr.msk.bf16.mxu1 %vm597_vm2, %v1918_v48  ;;  %v664_v48 = vld [vmem:[#allocation2 + $0x80] sm:$0xff]  ;;  %v5653_v18 = vpack.c.bf16 %v2230_v31, %v2229_v24  ;;  %v2852_v24 = vld [vmem:[#allocation2 + $0x91] sm:$0xff] }
  0x67   : > { %4586 = vmatprep.mubr.msk.bf16.mxu0 %vm597_vm2, %v752_v49  ;;  %v5561_v56 = vpack.c.bf16 %v664_v48, %v663_v47  ;;  %v2853_v31 = vld [vmem:[#allocation2 + $0x99] sm:$0xff] }
  0x6d   : > { %4427 = vmatmul.mubr.msk.bf16.gmra.mrb[20].mxu1 %vm597_vm2, %v752_v49  ;;  %v2209_v49 = vld [vmem:[#allocation2 + $0x92] sm:$0xff] }
  0x6e   : > { %4587 = vmatmul.mubr.msk.bf16.gmra.mrb[20].mxu0 %vm597_vm2, %v1920_v54  ;;  %4430 = vmatprep.mubr.msk.bf16.mxu1 %vm597_vm2, %v1920_v54  ;;  %v2212_v54 = vld [vmem:[#allocation2 + $0xb2] sm:$0xff]  ;;  %v5568_v58 = vpack.c.bf16 %v2210_v50, %v2209_v49 }
  0x6f   : > { %4590 = vmatprep.mubr.msk.bf16.mxu0 %vm597_vm2, %v754_v55  ;;  %v5572_v61 = vpack.c.bf16 %v2212_v54, %v2211_v53  ;;  %v679_v50 = vld [vmem:[#allocation2 + $0x138] sm:$0xff]  ;;  %v681_v54 = vld [vmem:[#allocation2 + $0x150] sm:$0xff] }
  0x70   : > { %v2226_v53 = vld [vmem:[#allocation2 + $0x15a] sm:$0xff]  ;;  %v5632_v0 = vpack.c.bf16 %v680_v51, %v679_v50  ;;  %v2844_v50 = vld [vmem:[#allocation2 + $0x31] sm:$0xff] }
  0x71   : > { %v2845_v51 = vld [vmem:[#allocation2 + $0x39] sm:$0xff] }
  0x75   : > { %4431 = vmatmul.mubr.msk.bf16.gmra.mrb[24].mxu1 %vm597_vm2, %v754_v55  ;;  %v5559_v55 = vld [vmem:[%s6041_s1 + $0xe0] sm:$0xff]  }
  0x76   : > { %4591 = vmatmul.mubr.msk.bf16.gmra.mrb[24].mxu0 %vm597_vm2, %v1922_v63  ;;  %4434 = vmatprep.mubr.msk.bf16.mxu1 %vm597_vm2, %v1922_v63  ;;  %v668_v63 = vld [vmem:[#allocation2 + $0xb0] sm:$0xff] }
  0x77   : > { %4594 = vmatprep.mubr.msk.bf16.mxu0 %vm597_vm2, %v5484_v28  ;;  %v5584_v23 = vpack.c.bf16 %v668_v63, %v667_v62  ;;  %v682_v62 = vld [vmem:[#allocation2 + $0x158] sm:$0xff]  ;;  %v2227_v63 = vld [vmem:[#allocation2 + $0x16a] sm:$0xff] }
  0x78   : > { %v5640_v3 = vpack.c.bf16 %v2228_v60, %v2227_v63  ;;  %v2848_v63 = vld [vmem:[#allocation2 + $0x61] sm:$0xff]  ;;  %v2849_v60 = vld [vmem:[#allocation2 + $0x69] sm:$0xff] }
  0x7d   : > { %4435 = vmatmul.mubr.msk.bf16.gmra.mrb[28].mxu1 %vm597_vm2, %v5484_v28 }
  0x7e   : > { %4595 = vmatmul.mubr.msk.bf16.gmra.mrb[28].mxu0 %vm597_vm2, %v5493_v27  ;;  %4446 = vmatprep.mubr.msk.bf16.mxu1 %vm597_vm2, %v685_v6  ;;  %v5588_v6 = vpack.c.bf16 %v670_v17, %v669_v1  ;;  %v5634_v1 = vpack.c.bf16 %v2226_v53, %v2225_v52  ;;  %v5636_v17 = vpack.c.bf16 %v682_v62, %v681_v54  ;;  %v2846_v54 = vld [vmem:[#allocation2 + $0x49] sm:$0xff]  ;;  %v2847_v62 = vld [vmem:[#allocation2 + $0x51] sm:$0xff] }
  0x7f   : > { %4606 = vmatprep.mubr.msk.bf16.mxu0 %vm597_vm2, %v5495_v7  ;;  %v2876_v53 = vpack.c.bf16 %v2845_v51, %v2844_v50  ;;  %v2877_v2 = vpack.c.bf16 %v2847_v62, %v2846_v54  ;;  %v2865_v50 = vld [vmem:[#allocation2 + $0x129] sm:$0xff]  ;;  %v2869_v54 = vld [vmem:[#allocation2 + $0x159] sm:$0xff] }
  0x85   : > { %4447 = vmatmul.mubr.msk.bf16.vlgmr.msra.gmra.mrb[0].mxu1 %vm597_vm2, %v5504_v21 }
  0x86   : > { %4607 = vmatmul.mubr.msk.bf16.vlgmr.msra.gmra.mrb[0].mxu0 %vm597_vm2, %v5506_v22  ;;  %4450 = vmatprep.mubr.msk.bf16.mxu1 %vm597_vm2, %v5508_v25 }
  0x87   : > { %4610 = vmatprep.mubr.msk.bf16.mxu0 %vm597_vm2, %v5510_v29  ;;  %4639 = vmatpush3.bf16.msra.mxu0 %v5449_v36  ;;  %v5540_v36 = vpack.c.bf16 %v2208_v40, %v2207_v39  ;;  %v2222_v39 = vld [vmem:[#allocation2 + $0x12a] sm:$0xff]  ;;  %v677_v40 = vld [vmem:[#allocation2 + $0x120] sm:$0xff] }
  0x88   : > { %4479 = vmatpush3.bf16.msra.mxu1 %v5454_v9  ;;  %4640 = vmatprep.subr.bf16.mxu0 %v5074_v30  ;;  %v5079_v9 = vld [vmem:[%s6041_s1 + $0xd8] sm:$0xff]   ;;  %v5618_v47 = vpack.c.bf16 %v2222_v39, %v2221_v38  ;;  %v2550_v39 = vld [vmem:[#allocation2 + $0x180] sm:$0xff] }
  0x89   : > { %4480 = vmatprep.subr.bf16.mxu1 %v5075_v32  ;;  %v5087_v38 = vld [vmem:[%s6041_s1 + $0xf8] sm:$0xff]  }
  0x8b   : > { %4641 = vmatpush3.bf16.msra.mxu0 %v5074_v30  ;;  %v2220_v30 = vld [vmem:[#allocation2 + $0x112] sm:$0xff] }
  0x8c   : > { %4481 = vmatpush3.bf16.msra.mxu1 %v5075_v32  ;;  %4642 = vmatprep.subr.bf16.mxu0 %v5077_v41  ;;  %v5600_v32 = vpack.c.bf16 %v672_v11, %v671_v10  ;;  %v5606_v35 = vpack.c.bf16 %v2220_v30, %v2219_v20  ;;  %v683_v10 = vld [vmem:[#allocation2 + $0x168] sm:$0xff]  ;;  %v684_v11 = vld [vmem:[#allocation2 + $0x170] sm:$0xff]  ;;  %v1264_v20 = vpack.c.bf16 %v1233_v13, %v1232_v12 }
  0x8d   : > { %4451 = vmatmul.mubr.msk.bf16.gmra.mrb[4].mxu1 %vm597_vm2, %v5531_v42  ;;  %4482 = vmatprep.subr.bf16.mxu1 %v5076_v43  ;;  %v5651_v14 = vpack.c.bf16 %v684_v11, %v683_v10  ;;  %v5082_v30 = vld [vmem:[%s6041_s1 + $0xe8] sm:$0xff]   ;;  %v2878_v10 = vpack.c.bf16 %v2849_v60, %v2848_v63  ;;  %v5090_v13 = vld [vmem:[%s6041_s1 + $0x110] sm:$0xff]  }
  0x8e   : > { %4611 = vmatmul.mubr.msk.bf16.gmra.mrb[4].mxu0 %vm597_vm2, %v5536_v44  ;;  %4454 = vmatprep.mubr.msk.bf16.mxu1 %vm597_vm2, %v5538_v45  ;;  %v5089_v11 = vld [vmem:[%s6041_s1 + $0x108] sm:$0xff]  }
  0x8f   : > { %4614 = vmatprep.mubr.msk.bf16.mxu0 %vm597_vm2, %v5540_v36  ;;  %4643 = vmatpush3.bf16.msra.mxu0 %v5077_v41  ;;  %v678_v41 = vld [vmem:[#allocation2 + $0x128] sm:$0xff] }
  0x90   : > { %4483 = vmatpush3.bf16.msra.mxu1 %v5076_v43  ;;  %4644 = vmatprep.subr.bf16.mxu0 %v5079_v9  ;;  %v2223_v43 = vld [vmem:[#allocation2 + $0x13a] sm:$0xff]  ;;  %v5620_v48 = vpack.c.bf16 %v678_v41, %v677_v40  ;;  %v2551_v40 = vld [vmem:[#allocation2 + $0x188] sm:$0xff] }
  0x91   : > { %4484 = vmatprep.subr.bf16.mxu1 %v5078_v46  ;;  %v5733_v41 = vpack.c.bf16 %v2551_v40, %v2550_v39  ;;  %v2851_v12 = vld [vmem:[#allocation2 + $0x81] sm:$0xff]  ;;  %v2861_v39 = vld [vmem:[#allocation2 + $0xf9] sm:$0xff] }
  0x93   : > { %4645 = vmatpush3.bf16.msra.mxu0 %v5079_v9  ;;  %v2224_v9 = vld [vmem:[#allocation2 + $0x142] sm:$0xff] }
  0x94   : > { %4485 = vmatpush3.bf16.msra.mxu1 %v5078_v46  ;;  %4678 = vmatprep.subr.bf16.mxu0 %v5559_v55  ;;  %v5616_v46 = vpack.c.bf16 %v676_v37, %v675_v26  ;;  %v5622_v49 = vpack.c.bf16 %v2224_v9, %v2223_v43  ;;  %v5083_v26 = vld [vmem:[%s6041_s1 + $0x68] sm:$0xff]   ;;  %v5084_v37 = vld [vmem:[%s6041_s1 + $0x70] sm:$0xff]   ;;  %v2552_v43 = vld [vmem:[#allocation2 + $0x198] sm:$0xff] }
  0x95   : > { %4455 = vmatmul.mubr.msk.bf16.gmra.mrb[8].mxu1 %vm597_vm2, %v5561_v56  ;;  %4518 = vmatprep.subr.bf16.mxu1 %v5566_v57  ;;  %v2553_v9 = vld [vmem:[#allocation2 + $0x1a0] sm:$0xff] }
  0x96   : > { %4615 = vmatmul.mubr.msk.bf16.gmra.mrb[8].mxu0 %vm597_vm2, %v5568_v58  ;;  %4458 = vmatprep.mubr.msk.bf16.mxu1 %vm597_vm2, %v5570_v59  ;;  %v2569_v52 = vpack.c.bf16 %v2553_v9, %v2552_v43  ;;  %v2864_v9 = vld [vmem:[#allocation2 + $0x121] sm:$0xff] }
  0x97   : > { %4618 = vmatprep.mubr.msk.bf16.mxu0 %vm597_vm2, %v5572_v61 }
  0x9d   : > { %4459 = vmatmul.mubr.msk.bf16.gmra.mrb[12].mxu1 %vm597_vm2, %v5584_v23 }
  0x9e   : > { %4619 = vmatmul.mubr.msk.bf16.gmra.mrb[12].mxu0 %vm597_vm2, %v5586_v4  ;;  %4462 = vmatprep.mubr.msk.bf16.mxu1 %vm597_vm2, %v5588_v6 }
  0x9f   : > { %4622 = vmatprep.mubr.msk.bf16.mxu0 %vm597_vm2, %v5590_v8 }
  0xa5   : > { %4463 = vmatmul.mubr.msk.bf16.gmra.mrb[16].mxu1 %vm597_vm2, %v5600_v32 }
  0xa6   : > { %4623 = vmatmul.mubr.msk.bf16.gmra.mrb[16].mxu0 %vm597_vm2, %v5602_v33  ;;  %4466 = vmatprep.mubr.msk.bf16.mxu1 %vm597_vm2, %v5604_v34 }
  0xa7   : > { %4626 = vmatprep.mubr.msk.bf16.mxu0 %vm597_vm2, %v5606_v35 }
  0xad   : > { %4467 = vmatmul.mubr.msk.bf16.gmra.mrb[20].mxu1 %vm597_vm2, %v5616_v46 }
  0xae   : > { %4627 = vmatmul.mubr.msk.bf16.gmra.mrb[20].mxu0 %vm597_vm2, %v5618_v47  ;;  %4470 = vmatprep.mubr.msk.bf16.mxu1 %vm597_vm2, %v5620_v48 }
  0xaf   : > { %4630 = vmatprep.mubr.msk.bf16.mxu0 %vm597_vm2, %v5622_v49 }
  0xb5   : > { %4471 = vmatmul.mubr.msk.bf16.gmra.mrb[24].mxu1 %vm597_vm2, %v5632_v0 }
  0xb6   : > { %4631 = vmatmul.mubr.msk.bf16.gmra.mrb[24].mxu0 %vm597_vm2, %v5634_v1  ;;  %4474 = vmatprep.mubr.msk.bf16.mxu1 %vm597_vm2, %v5636_v17 }
  0xb7   : > { %4634 = vmatprep.mubr.msk.bf16.mxu0 %vm597_vm2, %v5640_v3 }
  0xbd   : > { %4475 = vmatmul.mubr.msk.bf16.gmra.mrb[28].mxu1 %vm597_vm2, %v5651_v14 }
  0xbe   : > { %4635 = vmatmul.mubr.msk.bf16.gmra.mrb[28].mxu0 %vm597_vm2, %v5653_v18  ;;  %4486 = vmatprep.mubr.msk.bf16.mxu1 %vm597_vm2, %v1264_v20 }
  0xbf   : > { %4646 = vmatprep.mubr.msk.bf16.mxu0 %vm597_vm2, %v5508_v25 }
  0xc5   : > { %4487 = vmatmul.mubr.msk.bf16.vlgmr.msra.gmra.mrb[0].mxu1 %vm597_vm2, %v5495_v7  ;;  %v5085_v7 = vld [vmem:[%s6041_s1 + $0xf0] sm:$0xff]  }
  0xc6   : > { %4647 = vmatmul.mubr.msk.bf16.vlgmr.msra.gmra.mrb[0].mxu0 %vm597_vm2, %v5531_v42  ;;  %4490 = vmatprep.mubr.msk.bf16.mxu1 %vm597_vm2, %v5506_v22 }
  0xc7   : > { %4650 = vmatprep.mubr.msk.bf16.mxu0 %vm597_vm2, %v5538_v45  ;;  %4679 = vmatpush3.bf16.msra.mxu0 %v5559_v55  ;;  %v5086_v55 = vld [vmem:[%s6041_s1 + $0x78] sm:$0xff]  }
  0xc8   : > { %4519 = vmatpush3.bf16.msra.mxu1 %v5566_v57  ;;  %4680 = vmatprep.subr.bf16.mxu0 %v5082_v30  ;;  %v5088_v57 = vld [vmem:[%s6041_s1 + $0x100] sm:$0xff]  }
  0xc9   : > { %4520 = vmatprep.subr.bf16.mxu1 %v5083_v26 }
  0xcb   : > { %4681 = vmatpush3.bf16.msra.mxu0 %v5082_v30  ;;  %v2880_v30 = vpack.c.bf16 %v2853_v31, %v2852_v24 }
  0xcc   : > { %4521 = vmatpush3.bf16.msra.mxu1 %v5083_v26  ;;  %4682 = vmatprep.subr.bf16.mxu0 %v5085_v7  ;;  %v2855_v26 = vld [vmem:[#allocation2 + $0xb1] sm:$0xff] }
  0xcd   : > { %4491 = vmatmul.mubr.msk.bf16.gmra.mrb[4].mxu1 %vm597_vm2, %v5510_v29  ;;  %4522 = vmatprep.subr.bf16.mxu1 %v5084_v37 }
  0xce   : > { %4651 = vmatmul.mubr.msk.bf16.gmra.mrb[4].mxu0 %vm597_vm2, %v5561_v56  ;;  %4494 = vmatprep.mubr.msk.bf16.mxu1 %vm597_vm2, %v5536_v44 }
  0xcf   : > { %4654 = vmatprep.mubr.msk.bf16.mxu0 %vm597_vm2, %v5570_v59  ;;  %4683 = vmatpush3.bf16.msra.mxu0 %v5085_v7  ;;  %v2856_v7 = vld [vmem:[#allocation2 + $0xc1] sm:$0xff] }
  0xd0   : > { %4523 = vmatpush3.bf16.msra.mxu1 %v5084_v37  ;;  %4684 = vmatprep.subr.bf16.mxu0 %v5087_v38  ;;  %v2857_v37 = vld [vmem:[#allocation2 + $0xc9] sm:$0xff] }
  0xd1   : > { %4524 = vmatprep.subr.bf16.mxu1 %v5086_v55 }
  0xd3   : > { %4685 = vmatpush3.bf16.msra.mxu0 %v5087_v38 }
  0xd4   : > { %4525 = vmatpush3.bf16.msra.mxu1 %v5086_v55  ;;  %4718 = vmatprep.subr.bf16.mxu0 %v5088_v57  ;;  %v2882_v55 = vpack.c.bf16 %v2857_v37, %v2856_v7 }
  0xd5   : > { %4495 = vmatmul.mubr.msk.bf16.gmra.mrb[8].mxu1 %vm597_vm2, %v5540_v36 }
  0xd6   : > { %4655 = vmatmul.mubr.msk.bf16.gmra.mrb[8].mxu0 %vm597_vm2, %v5584_v23  ;;  %4498 = vmatprep.mubr.msk.bf16.mxu1 %vm597_vm2, %v5568_v58 }
  0xd7   : > { %4658 = vmatprep.mubr.msk.bf16.mxu0 %vm597_vm2, %v5588_v6 }
  0xdd   : > { %4499 = vmatmul.mubr.msk.bf16.gmra.mrb[12].mxu1 %vm597_vm2, %v5572_v61 }
  0xde   : > { %4659 = vmatmul.mubr.msk.bf16.gmra.mrb[12].mxu0 %vm597_vm2, %v5600_v32  ;;  %4502 = vmatprep.mubr.msk.bf16.mxu1 %vm597_vm2, %v5586_v4 }
  0xdf   : > { %4662 = vmatprep.mubr.msk.bf16.mxu0 %vm597_vm2, %v5604_v34 }
  0xe5   : > { %4503 = vmatmul.mubr.msk.bf16.gmra.mrb[16].mxu1 %vm597_vm2, %v5590_v8 }
  0xe6   : > { %4663 = vmatmul.mubr.msk.bf16.gmra.mrb[16].mxu0 %vm597_vm2, %v5616_v46  ;;  %4506 = vmatprep.mubr.msk.bf16.mxu1 %vm597_vm2, %v5602_v33 }
  0xe7   : > { %4666 = vmatprep.mubr.msk.bf16.mxu0 %vm597_vm2, %v5620_v48 }
  0xed   : > { %4507 = vmatmul.mubr.msk.bf16.gmra.mrb[20].mxu1 %vm597_vm2, %v5606_v35 }
  0xee   : > { %4667 = vmatmul.mubr.msk.bf16.gmra.mrb[20].mxu0 %vm597_vm2, %v5632_v0  ;;  %4510 = vmatprep.mubr.msk.bf16.mxu1 %vm597_vm2, %v5618_v47 }
  0xef   : > { %4670 = vmatprep.mubr.msk.bf16.mxu0 %vm597_vm2, %v5636_v17 }
  0xf5   : > { %4511 = vmatmul.mubr.msk.bf16.gmra.mrb[24].mxu1 %vm597_vm2, %v5622_v49 }
  0xf6   : > { %4671 = vmatmul.mubr.msk.bf16.gmra.mrb[24].mxu0 %vm597_vm2, %v5651_v14  ;;  %4514 = vmatprep.mubr.msk.bf16.mxu1 %vm597_vm2, %v5634_v1 }
  0xf7   : > { %4674 = vmatprep.mubr.msk.bf16.mxu0 %vm597_vm2, %v5733_v41 }
  0xfd   : > { %4515 = vmatmul.mubr.msk.bf16.gmra.mrb[28].mxu1 %vm597_vm2, %v5640_v3 }
  0xfe   : > { %4675 = vmatmul.mubr.msk.bf16.gmra.mrb[28].mxu0 %vm597_vm2, %v2569_v52  ;;  %4526 = vmatprep.mubr.msk.bf16.mxu1 %vm597_vm2, %v5504_v21  ;;  %v2850_v21 = vld [vmem:[#allocation2 + $0x79] sm:$0xff]  ;;  %v2886_v52 = vpack.c.bf16 %v2865_v50, %v2864_v9 }
  0xff   : > { %4686 = vmatprep.mubr.msk.bf16.mxu0 %vm597_vm2, %v2876_v53  ;;  %v2879_v20 = vpack.c.bf16 %v2851_v12, %v2850_v21  ;;  %v2868_v53 = vld [vmem:[#allocation2 + $0x151] sm:$0xff] }
 0x100   : > { %v2888_v63 = vpack.c.bf16 %v2869_v54, %v2868_v53 }
 0x105   : > { %4527 = vmatmul.mubr.msk.bf16.vlgmr.msra.gmra.mrb[0].mxu1 %vm597_vm2, %v5508_v25  ;;  %v5091_v25 = vld [vmem:[%s6041_s1 + $0x118] sm:$0xff]  }
 0x106   : > { %4687 = vmatmul.mubr.msk.bf16.vlgmr.msra.gmra.mrb[0].mxu0 %vm597_vm2, %v2877_v2  ;;  %4530 = vmatprep.mubr.msk.bf16.mxu1 %vm597_vm2, %v5531_v42  ;;  %v2854_v42 = vld [vmem:[#allocation2 + $0xa9] sm:$0xff] }
 0x107   : > { %4690 = vmatprep.mubr.msk.bf16.mxu0 %vm597_vm2, %v2878_v10  ;;  %4719 = vmatpush3.bf16.msra.mxu0 %v5088_v57  ;;  %v2881_v38 = vpack.c.bf16 %v2855_v26, %v2854_v42  ;;  %v2860_v57 = vld [vmem:[#allocation2 + $0xf1] sm:$0xff] }
 0x108   : > { %4720 = vmatprep.subr.bf16.mxu0 %v5089_v11  ;;  %v2884_v43 = vpack.c.bf16 %v2861_v39, %v2860_v57 }
 0x10b   : > { %4721 = vmatpush3.bf16.msra.mxu0 %v5089_v11 }
 0x10c   : > { %4722 = vmatprep.subr.bf16.mxu0 %v5090_v13 }
 0x10d   : > { %4531 = vmatmul.mubr.msk.bf16.gmra.mrb[4].mxu1 %vm597_vm2, %v5538_v45  ;;  %v2858_v45 = vld [vmem:[#allocation2 + $0xd9] sm:$0xff] }
 0x10e   : > { %4691 = vmatmul.mubr.msk.bf16.gmra.mrb[4].mxu0 %vm597_vm2, %v2879_v20  ;;  %4534 = vmatprep.mubr.msk.bf16.mxu1 %vm597_vm2, %v5561_v56  ;;  %v2859_v56 = vld [vmem:[#allocation2 + $0xe1] sm:$0xff] }
 0x10f   : > { %4694 = vmatprep.mubr.msk.bf16.mxu0 %vm597_vm2, %v2880_v30  ;;  %4723 = vmatpush3.bf16.msra.mxu0 %v5090_v13  ;;  %v2883_v40 = vpack.c.bf16 %v2859_v56, %v2858_v45 }
 0x110   : > { %4724 = vmatprep.subr.bf16.mxu0 %v5091_v25 }
 0x113   : > { %4725 = vmatpush3.bf16.msra.mxu0 %v5091_v25 }
 0x115   : > { %4535 = vmatmul.mubr.msk.bf16.gmra.mrb[8].mxu1 %vm597_vm2, %v5570_v59  ;;  %v2862_v59 = vld [vmem:[#allocation2 + $0x109] sm:$0xff] }
 0x116   : > { %4695 = vmatmul.mubr.msk.bf16.gmra.mrb[8].mxu0 %vm597_vm2, %v2881_v38  ;;  %4538 = vmatprep.mubr.msk.bf16.mxu1 %vm597_vm2, %v5584_v23  ;;  %v2863_v23 = vld [vmem:[#allocation2 + $0x111] sm:$0xff] }
 0x117   : > { %4698 = vmatprep.mubr.msk.bf16.mxu0 %vm597_vm2, %v2882_v55  ;;  %v2885_v51 = vpack.c.bf16 %v2863_v23, %v2862_v59  ;;  %v5892_v55 = vld [vmem:[%s6042_s2] ss:$0 sm:$0xff] }
 0x11d   : > { %4539 = vmatmul.mubr.msk.bf16.gmra.mrb[12].mxu1 %vm597_vm2, %v5588_v6  ;;  %v2866_v6 = vld [vmem:[#allocation2 + $0x139] sm:$0xff] }
 0x11e   : > { %4699 = vmatmul.mubr.msk.bf16.gmra.mrb[12].mxu0 %vm597_vm2, %v2883_v40  ;;  %4542 = vmatprep.mubr.msk.bf16.mxu1 %vm597_vm2, %v5600_v32  ;;  %v2867_v32 = vld [vmem:[#allocation2 + $0x141] sm:$0xff] }
 0x11f   : > { %4702 = vmatprep.mubr.msk.bf16.mxu0 %vm597_vm2, %v2884_v43  ;;  %v2887_v62 = vpack.c.bf16 %v2867_v32, %v2866_v6 }
 0x125   : > { %4543 = vmatmul.mubr.msk.bf16.gmra.mrb[16].mxu1 %vm597_vm2, %v5604_v34  ;;  %v2874_v34 = vld [vmem:[#allocation2 + $0x199] sm:$0xff] }
 0x126   : > { %4703 = vmatmul.mubr.msk.bf16.gmra.mrb[16].mxu0 %vm597_vm2, %v2885_v51  ;;  %4546 = vmatprep.mubr.msk.bf16.mxu1 %vm597_vm2, %v5616_v46  ;;  %v2875_v46 = vld [vmem:[#allocation2 + $0x1a1] sm:$0xff] }
 0x127   : > { %4706 = vmatprep.mubr.msk.bf16.mxu0 %vm597_vm2, %v2886_v52 }
 0x12d   : > { %4547 = vmatmul.mubr.msk.bf16.gmra.mrb[20].mxu1 %vm597_vm2, %v5620_v48  ;;  %v2891_v48 = vpack.c.bf16 %v2875_v46, %v2874_v34 }
 0x12e   : > { %4707 = vmatmul.mubr.msk.bf16.gmra.mrb[20].mxu0 %vm597_vm2, %v2887_v62  ;;  %4550 = vmatprep.mubr.msk.bf16.mxu1 %vm597_vm2, %v5632_v0 }
 0x12f   : > { %4710 = vmatprep.mubr.msk.bf16.mxu0 %vm597_vm2, %v2888_v63 }
 0x135   : > { %4551 = vmatmul.mubr.msk.bf16.gmra.mrb[24].mxu1 %vm597_vm2, %v5636_v17 }
 0x136   : > { %4711 = vmatmul.mubr.msk.bf16.gmra.mrb[24].mxu0 %vm597_vm2, %v5484_v28  ;;  %4554 = vmatprep.mubr.msk.bf16.mxu1 %vm597_vm2, %v5651_v14  ;;  %v3196_v28 = vld [vmem:[#allocation2 + $0x19a] sm:$0xff] }
 0x137   : > { %4714 = vmatprep.mubr.msk.bf16.mxu0 %vm597_vm2, %v5493_v27  ;;  %v3197_v27 = vld [vmem:[#allocation2 + $0x1a2] sm:$0xff] }
 0x13d   : > { %4555 = vmatmul.mubr.msk.bf16.gmra.mrb[28].mxu1 %vm597_vm2, %v5733_v41 }
 0x13e   : > { %4715 = vmatmul.mubr.msk.bf16.gmra.mrb[28].mxu0 %vm597_vm2, %v2891_v48 }
 0x13f   : > { %4726 = vmatprep.mubr.msk.bf16.mxu0 %vm597_vm2, %v5506_v22  ;;  %v3213_v22 = vpack.c.bf16 %v3197_v27, %v3196_v28 }
 0x146   : > { %4727 = vmatmul.mubr.msk.bf16.vlgmr.msra.gmra.mrb[0].mxu0 %vm597_vm2, %v5510_v29 }
 0x147   : > { %4730 = vmatprep.mubr.msk.bf16.mxu0 %vm597_vm2, %v5536_v44 }
 0x14e   : > { %4731 = vmatmul.mubr.msk.bf16.gmra.mrb[4].mxu0 %vm597_vm2, %v5540_v36 }
 0x14f   : > { %4734 = vmatprep.mubr.msk.bf16.mxu0 %vm597_vm2, %v5568_v58 }
 0x156   : > { %4735 = vmatmul.mubr.msk.bf16.gmra.mrb[8].mxu0 %vm597_vm2, %v5572_v61 }
 0x157   : > { %4738 = vmatprep.mubr.msk.bf16.mxu0 %vm597_vm2, %v5586_v4 }
 0x15e   : > { %4739 = vmatmul.mubr.msk.bf16.gmra.mrb[12].mxu0 %vm597_vm2, %v5590_v8  ;;  %v5839_v8 = vld [vmem:[%s6043_s3] sm:$0xff] }
 0x15f   : > { %4742 = vmatprep.mubr.msk.bf16.mxu0 %vm597_vm2, %v5602_v33 }
 0x166   : > { %4743 = vmatmul.mubr.msk.bf16.gmra.mrb[16].mxu0 %vm597_vm2, %v5606_v35  ;;  %v3561_v35 = vcombine.high %v5839_v8, %v5839_v8 }
 0x167   : > { %4746 = vmatprep.mubr.msk.bf16.mxu0 %vm597_vm2, %v5618_v47 }
 0x168   : > { %3627 = vmatprep.mubr.f32.mxu1 %v3561_v35 }
 0x16e   : > { %4747 = vmatmul.mubr.msk.bf16.gmra.mrb[20].mxu0 %vm597_vm2, %v5622_v49 }
 0x16f   : > { %4750 = vmatprep.mubr.msk.bf16.mxu0 %vm597_vm2, %v5634_v1 }
 0x176   : > { %4751 = vmatmul.mubr.msk.bf16.gmra.mrb[24].mxu0 %vm597_vm2, %v5640_v3 }
 0x177   : > { %4754 = vmatprep.mubr.msk.bf16.mxu0 %vm597_vm2, %v5653_v18 }
 0x17e   : > { %4755 = vmatmul.mubr.msk.bf16.gmra.mrb[28].mxu0 %vm597_vm2, %v3213_v22 }
 0x1d8   : > { %v4528_v29 = vpop.f32.mrb[0].mxu1 }
 0x1d9   : > { %v1718_v44 = vpop.f32.mrb[1].mxu1 }
 0x1da   : > { %v4529_v36 = vpop.f32.mrb[2].mxu1 }
 0x1db   : > { %v1721_v58 = vpop.f32.mrb[3].mxu1 }
 0x1e0   : > { %v4532_v61 = vpop.f32.mrb[4].mxu1 }
 0x1e1   : > { %v1734_v4 = vpop.f32.mrb[5].mxu1 }
 0x1e2   : > { %v4533_v33 = vpop.f32.mrb[6].mxu1 }
 0x1e3   : > { %v1737_v47 = vpop.f32.mrb[7].mxu1 }
 0x1e8   : > { %v4536_v49 = vpop.f32.mrb[8].mxu1 }
 0x1e9   : > { %v5843_v0 = vpop.f32.mrb[9].mxu1 }
 0x1ea   : > { %v5845_v1 = vpop.f32.mrb[10].mxu1 }
 0x1eb   : > { %v5847_v17 = vpop.f32.mrb[11].mxu1 }
 0x1f0   : > { %v5849_v3 = vpop.f32.mrb[12].mxu1 }
 0x1f1   : > { %v5851_v14 = vpop.f32.mrb[13].mxu1 }
 0x1f2   : > { %v5853_v18 = vpop.f32.mrb[14].mxu1 }
 0x1f3   : > { %v5855_v41 = vpop.f32.mrb[15].mxu1 }
 0x1f8   : > { %v5857_v60 = vpop.f32.mrb[16].mxu1 }
 0x1f9   : > { %v5859_v2 = vpop.f32.mrb[17].mxu1 }
 0x1fa   : > { %v5861_v10 = vpop.f32.mrb[18].mxu1 }
 0x1fb   : > { %v5863_v11 = vpop.f32.mrb[19].mxu1 }
 0x200   : > { %v5865_v21 = vpop.f32.mrb[20].mxu1 }
 0x201   : > { %v5867_v12 = vpop.f32.mrb[21].mxu1 }
 0x202   : > { %v5869_v24 = vpop.f32.mrb[22].mxu1 }
 0x203   : > { %v5871_v31 = vpop.f32.mrb[23].mxu1 }
 0x208   : > { %v5873_v13 = vpop.f32.mrb[24].mxu1 }
 0x209   : > { %v5875_v20 = vpop.f32.mrb[25].mxu1 }
 0x20a   : > { %v5877_v30 = vpop.f32.mrb[26].mxu1 }
 0x20b   : > { %v5879_v25 = vpop.f32.mrb[27].mxu1 }
 0x210   : > { %v5881_v42 = vpop.f32.mrb[28].mxu1 }
 0x211   : > { %v5883_v26 = vpop.f32.mrb[29].mxu1 }
 0x212   : > { %v5885_v7 = vpop.f32.mrb[30].mxu1 }
 0x213   : > { %v5887_v37 = vpop.f32.mrb[31].mxu1 }
 0x219   : > { %v4728_v38 = vpop.f32.mrb[0].mxu0 }
 0x21a   : > { %v4790_v45 = vadd.f32 %v4728_v38, %v4528_v29  ;;  %v3329_v56 = vpop.f32.mrb[1].mxu0 }
 0x21b   : > { %v4791_v57 = vadd.f32 %v3329_v56, %v1718_v44  ;;  %v4729_v39 = vpop.f32.mrb[2].mxu0 }
 0x21c   : > { %v3497_v40 = vadd.f32 %v4790_v45, %v5892_v55  ;;  %v4792_v43 = vadd.f32 %v4729_v39, %v4529_v36  ;;  %v3332_v59 = vpop.f32.mrb[3].mxu0 }
 0x21d   : > { %v3495_v23 = vadd.f32 %v4791_v57, %v5892_v55  ;;  %v4793_v9 = vadd.f32 %v3332_v59, %v1721_v58 }
 0x21e   : > { %v3498_v50 = vadd.f32 %v4792_v43, %v5892_v55  ;;  %v3529_v52 = vmax.f32 %v3497_v40, 0.0 }
 0x21f   : > { %v3496_v51 = vadd.f32 %v4793_v9, %v5892_v55  ;;  %v3527_v32 = vmax.f32 %v3495_v23, 0.0 }
 0x220   : > { %v3530_v6 = vmax.f32 %v3498_v50, 0.0 }
 0x221   : > { %v3528_v53 = vmax.f32 %v3496_v51, 0.0  ;;  %v4732_v54 = vpop.f32.mrb[4].mxu0 }
 0x222   : > { %v5898_v62 = vpack.c.bf16 %v3530_v6, %v3529_v52  ;;  %v4794_v63 = vadd.f32 %v4732_v54, %v4532_v61  ;;  %v3345_v34 = vpop.f32.mrb[5].mxu0 }
 0x223   : > { %v5900_v46 = vpack.c.bf16 %v3528_v53, %v3527_v32  ;;  %v4795_v48 = vadd.f32 %v3345_v34, %v1734_v4  ;;  %v4733_v28 = vpop.f32.mrb[6].mxu0 }
 0x224   : > { %v3501_v27 = vadd.f32 %v4794_v63, %v5892_v55  ;;  %v4796_v22 = vadd.f32 %v4733_v28, %v4533_v33  ;;  %v3348_v29 = vpop.f32.mrb[7].mxu0 }
 0x225   : > { %v3499_v44 = vadd.f32 %v4795_v48, %v5892_v55  ;;  %v4797_v36 = vadd.f32 %v3348_v29, %v1737_v47 }
 0x226   : > { %v3502_v58 = vadd.f32 %v4796_v22, %v5892_v55  ;;  %v3533_v38 = vmax.f32 %v3501_v27, 0.0 }
 0x227   : > { %v3500_v35 = vadd.f32 %v4797_v36, %v5892_v55  ;;  %v3531_v56 = vmax.f32 %v3499_v44, 0.0 }
 0x228   : > { %v3534_v45 = vmax.f32 %v3502_v58, 0.0 }
 0x229   : > { %v3532_v61 = vmax.f32 %v3500_v35, 0.0  ;;  %v4736_v57 = vpop.f32.mrb[8].mxu0 }
 0x22a   : > { %v5906_v39 = vpack.c.bf16 %v3534_v45, %v3533_v38  ;;  %v4798_v4 = vadd.f32 %v4736_v57, %v4536_v49  ;;  %v3361_v40 = vpop.f32.mrb[9].mxu0 }
 0x22b   : > { %v5908_v43 = vpack.c.bf16 %v3532_v61, %v3531_v56  ;;  %v4799_v33 = vadd.f32 %v3361_v40, %v5843_v0  ;;  %v4737_v59 = vpop.f32.mrb[10].mxu0 }
 0x22c   : > { %v3505_v47 = vadd.f32 %v4798_v4, %v5892_v55  ;;  %v4800_v23 = vadd.f32 %v4737_v59, %v5845_v1  ;;  %v3364_v9 = vpop.f32.mrb[11].mxu0 }
 0x22d   : > { %v3503_v50 = vadd.f32 %v4799_v33, %v5892_v55  ;;  %v4801_v51 = vadd.f32 %v3364_v9, %v5847_v17 }
 0x22e   : > { %v3506_v52 = vadd.f32 %v4800_v23, %v5892_v55  ;;  %v3537_v49 = vmax.f32 %v3505_v47, 0.0 }
 0x22f   : > { %v3504_v6 = vadd.f32 %v4801_v51, %v5892_v55  ;;  %v3535_v53 = vmax.f32 %v3503_v50, 0.0 }
 0x230   : > { %v3538_v32 = vmax.f32 %v3506_v52, 0.0 }
 0x231   : > { %v3536_v54 = vmax.f32 %v3504_v6, 0.0  ;;  %v4740_v63 = vpop.f32.mrb[12].mxu0 }
 0x232   : > { %v5917_v0 = vpack.c.bf16 %v3538_v32, %v3537_v49  ;;  %v4802_v34 = vadd.f32 %v4740_v63, %v5849_v3  ;;  %v3377_v48 = vpop.f32.mrb[13].mxu0 }
 0x233   : > { %v5920_v1 = vpack.c.bf16 %v3536_v54, %v3535_v53  ;;  %v4803_v28 = vadd.f32 %v3377_v48, %v5851_v14  ;;  %v4741_v27 = vpop.f32.mrb[14].mxu0 }
 0x234   : > { %v3509_v17 = vadd.f32 %v4802_v34, %v5892_v55  ;;  %v4804_v22 = vadd.f32 %v4741_v27, %v5853_v18  ;;  %v3380_v29 = vpop.f32.mrb[15].mxu0 }
 0x235   : > { %v3507_v44 = vadd.f32 %v4803_v28, %v5892_v55  ;;  %v4805_v36 = vadd.f32 %v3380_v29, %v5855_v41 }
 0x236   : > { %v3510_v58 = vadd.f32 %v4804_v22, %v5892_v55  ;;  %v3541_v3 = vmax.f32 %v3509_v17, 0.0 }
 0x237   : > { %v3508_v35 = vadd.f32 %v4805_v36, %v5892_v55  ;;  %v3539_v45 = vmax.f32 %v3507_v44, 0.0 }
 0x238   : > { %v3542_v38 = vmax.f32 %v3510_v58, 0.0 }
 0x239   : > { %v3540_v56 = vmax.f32 %v3508_v35, 0.0  ;;  %v4744_v61 = vpop.f32.mrb[16].mxu0 }
 0x23a   : > { %v5929_v14 = vpack.c.bf16 %v3542_v38, %v3541_v3  ;;  %v4806_v57 = vadd.f32 %v4744_v61, %v5857_v60  ;;  %v3393_v4 = vpop.f32.mrb[17].mxu0 }
 0x23b   : > { %v5932_v18 = vpack.c.bf16 %v3540_v56, %v3539_v45  ;;  %v4807_v40 = vadd.f32 %v3393_v4, %v5859_v2  ;;  %v4745_v33 = vpop.f32.mrb[18].mxu0 }
 0x23c   : > { %v3513_v41 = vadd.f32 %v4806_v57, %v5892_v55  ;;  %v4808_v59 = vadd.f32 %v4745_v33, %v5861_v10  ;;  %v3396_v47 = vpop.f32.mrb[19].mxu0 }
 0x23d   : > { %v3511_v23 = vadd.f32 %v4807_v40, %v5892_v55  ;;  %v4809_v9 = vadd.f32 %v3396_v47, %v5863_v11 }
 0x23e   : > { %v3514_v50 = vadd.f32 %v4808_v59, %v5892_v55  ;;  %v3545_v60 = vmax.f32 %v3513_v41, 0.0 }
 0x23f   : > { %v3512_v51 = vadd.f32 %v4809_v9, %v5892_v55  ;;  %v3543_v6 = vmax.f32 %v3511_v23, 0.0 }
 0x240   : > { %v3546_v52 = vmax.f32 %v3514_v50, 0.0 }
 0x241   : > { %v3544_v49 = vmax.f32 %v3512_v51, 0.0  ;;  %v4748_v32 = vpop.f32.mrb[20].mxu0 }
 0x242   : > { %v4810_v2 = vadd.f32 %v4748_v32, %v5865_v21  ;;  %v3409_v53 = vpop.f32.mrb[21].mxu0  ;;  %v4762_v54 = vpack.c.bf16 %v3546_v52, %v3545_v60 }
 0x243   : > { %v4811_v10 = vadd.f32 %v3409_v53, %v5867_v12  ;;  %v4749_v63 = vpop.f32.mrb[22].mxu0  ;;  %v4758_v34 = vpack.c.bf16 %v3544_v49, %v3543_v6 }
 0x244   : > { %v3517_v48 = vadd.f32 %v4810_v2, %v5892_v55  ;;  %v4812_v11 = vadd.f32 %v4749_v63, %v5869_v24  ;;  %v3412_v28 = vpop.f32.mrb[23].mxu0  ;;  %v5138_v63 = vmov 0  }
 0x245   : > { %v3515_v27 = vadd.f32 %v4811_v10, %v5892_v55  ;;  %v4813_v17 = vadd.f32 %v3412_v28, %v5871_v31  ;;  %4759 = vmatprep.subr.bf16.mxu1 %v4758_v34  ;;  %v5107_v10 = vld [vmem:[%s6044_s4 + $0xc] ss:$16 sps:$4 sm:$0xff]   ;;  %v5105_v28 = vld [vmem:[%s6044_s4 + $0x8] ss:$16 sps:$4 sm:$0xff]  }
 0x246   : > { %v3518_v22 = vadd.f32 %v4812_v11, %v5892_v55  ;;  %4761 = vmatpush3.bf16.msra.mxu1 %v5900_v46  ;;  %v3549_v12 = vmax.f32 %v3517_v48, 0.0 }
 0x247   : > { %v3516_v21 = vadd.f32 %v4813_v17, %v5892_v55  ;;  %4763 = vmatprep.subr.bf16.mxu1 %v4762_v54  ;;  %v3547_v44 = vmax.f32 %v3515_v27, 0.0  ;;  %v5102_v54 = vld [vmem:[%s6044_s4 + $0x60] ss:$16 sps:$4 sm:$0xff]   ;;  %v5110_v17 = vld [vmem:[%s6044_s4 + $0x2c] ss:$16 sps:$4 sm:$0xff]  }
 0x248   : > { %v3550_v29 = vmax.f32 %v3518_v22, 0.0  ;;  %v5108_v22 = vld [vmem:[%s6044_s4 + $0x28] ss:$16 sps:$4 sm:$0xff]  }
 0x249   : > { %v3548_v36 = vmax.f32 %v3516_v21, 0.0  ;;  %v4752_v58 = vpop.f32.mrb[24].mxu0  ;;  %v5113_v21 = vld [vmem:[%s6044_s4 + $0x4c] ss:$16 sps:$4 sm:$0xff]  }
 0x24a   : > { %v4814_v24 = vadd.f32 %v4752_v58, %v5873_v13  ;;  %v3425_v35 = vpop.f32.mrb[25].mxu0  ;;  %4765 = vmatpush3.bf16.msra.mxu1 %v5898_v62  ;;  %v4770_v3 = vpack.c.bf16 %v3550_v29, %v3549_v12  ;;  %v5111_v12 = vld [vmem:[%s6044_s4 + $0x48] ss:$16 sps:$4 sm:$0xff]   ;;  %v5116_v29 = vld [vmem:[%s6044_s4 + $0x6c] ss:$16 sps:$4 sm:$0xff]  }
 0x24b   : > { %v4815_v31 = vadd.f32 %v3425_v35, %v5875_v20  ;;  %v4753_v38 = vpop.f32.mrb[26].mxu0  ;;  %v4766_v45 = vpack.c.bf16 %v3548_v36, %v3547_v44  ;;  %v5114_v44 = vld [vmem:[%s6044_s4 + $0x68] ss:$16 sps:$4 sm:$0xff]   ;;  %v3650_v36 = vld [vmem:[%s6045_s5] sm:$0xf] }
 0x24c   : > { %v3521_v46 = vadd.f32 %v4814_v24, %v5892_v55  ;;  %v4816_v56 = vadd.f32 %v4753_v38, %v5877_v30  ;;  %v3428_v61 = vpop.f32.mrb[27].mxu0  ;;  %v3655_v58 = vrot.slane %v3650_v36, %v5218_v15  ;;  %v3659_v24 = vrot.slane %v3650_v36, %v285_v16 }
 0x24d   : > { %v3519_v57 = vadd.f32 %v4815_v31, %v5892_v55  ;;  %v4817_v4 = vadd.f32 %v3428_v61, %v5879_v25  ;;  %4767 = vmatprep.subr.bf16.mxu1 %v4766_v45  ;;  %v3666_v15 = vsub.s32 3, %v5196_v5  ;;  %v3663_v16 = vrot.slane %v3650_v36, %v295_v19 }
 0x24e   : > { %v3522_v13 = vadd.f32 %v4816_v56, %v5892_v55  ;;  %4769 = vmatpush3.bf16.msra.mxu1 %v5908_v43  ;;  %v3553_v20 = vmax.f32 %v3521_v46, 0.0 }
 0x24f   : > { %v3520_v62 = vadd.f32 %v4817_v4, %v5892_v55  ;;  %4771 = vmatprep.subr.bf16.mxu1 %v4770_v3  ;;  %v3551_v33 = vmax.f32 %v3519_v57, 0.0  ;;  %v3667_v4 = vrot.slane %v3650_v36, %v3666_v15 }
 0x250   : > { %v3554_v40 = vmax.f32 %v3522_v13, 0.0 }
 0x251   : > { %v3552_v41 = vmax.f32 %v3520_v62, 0.0  ;;  %v4756_v59 = vpop.f32.mrb[28].mxu0 }
 0x252   : > { %v4818_v30 = vadd.f32 %v4756_v59, %v5881_v42  ;;  %v3441_v47 = vpop.f32.mrb[29].mxu0  ;;  %4773 = vmatpush3.bf16.msra.mxu1 %v5906_v39  ;;  %v4778_v23 = vpack.c.bf16 %v3554_v40, %v3553_v20 }
 0x253   : > { %v4819_v25 = vadd.f32 %v3441_v47, %v5883_v26  ;;  %v4757_v9 = vpop.f32.mrb[30].mxu0  ;;  %v4774_v50 = vpack.c.bf16 %v3552_v41, %v3551_v33 }
 0x254   : > { %v3525_v43 = vadd.f32 %v4818_v30, %v5892_v55  ;;  %v4820_v51 = vadd.f32 %v4757_v9, %v5885_v7  ;;  %v3444_v60 = vpop.f32.mrb[31].mxu0 }
 0x255   : > { %v3523_v52 = vadd.f32 %v4819_v25, %v5892_v55  ;;  %v4821_v6 = vadd.f32 %v3444_v60, %v5887_v37  ;;  %4775 = vmatprep.subr.bf16.mxu1 %v4774_v50  ;;  %v5095_v37 = vld [vmem:[%s6044_s4 + $0x4] ss:$16 sps:$4 sm:$0xff]  }
 0x256   : > { %v3526_v42 = vadd.f32 %v4820_v51, %v5892_v55  ;;  %4777 = vmatpush3.bf16.msra.mxu1 %v5920_v1  ;;  %v3557_v26 = vmax.f32 %v3525_v43, 0.0  ;;  %v5096_v1 = vld [vmem:[%s6044_s4 + $0x20] ss:$16 sps:$4 sm:$0xff]  }
 0x257   : > { %v3524_v39 = vadd.f32 %v4821_v6, %v5892_v55  ;;  %4779 = vmatprep.subr.bf16.mxu1 %v4778_v23  ;;  %v3555_v32 = vmax.f32 %v3523_v52, 0.0  ;;  %v5093_v55 = vld [vmem:[%s6044_s4] ss:$16 sps:$4 sm:$0xff]  }
 0x258   : > { %v3558_v49 = vmax.f32 %v3526_v42, 0.0 }
 0x259   : > { %v3556_v2 = vmax.f32 %v3524_v39, 0.0 }
 0x25a   : > { %4781 = vmatpush3.bf16.msra.mxu1 %v5917_v0  ;;  %v4786_v7 = vpack.c.bf16 %v3558_v49, %v3557_v26  ;;  %v5098_v0 = vld [vmem:[%s6044_s4 + $0x24] ss:$16 sps:$4 sm:$0xff]  }
 0x25b   : > { %v4782_v53 = vpack.c.bf16 %v3556_v2, %v3555_v32 }
 0x25d   : > { %4783 = vmatprep.subr.bf16.mxu1 %v4782_v53 }
 0x25e   : > { %4785 = vmatpush3.bf16.msra.mxu1 %v5932_v18  ;;  %v5099_v18 = vld [vmem:[%s6044_s4 + $0x40] ss:$16 sps:$4 sm:$0xff]  }
 0x25f   : > { %4787 = vmatprep.subr.bf16.mxu1 %v4786_v7 }
 0x262   : > { %4789 = vmatpush3.bf16.msra.mxu1 %v5929_v14  ;;  %v5101_v14 = vld [vmem:[%s6044_s4 + $0x44] ss:$16 sps:$4 sm:$0xff]  }
 0x263   : > { %3755 = vmatprep.subr.bf16.mxu1 %v5095_v37 }
 0x265   : > { %3628 = vmatmul.mubr.f32.vlgmr.msra.gmra.mrb[32].mxu1 %v5839_v8  ;;  %v5104_v8 = vld [vmem:[%s6044_s4 + $0x64] ss:$16 sps:$4 sm:$0xff]  }
 0x266   : > { %3756 = vmatpush1.bf16.msra.mxu1 %v5093_v55  ;;  %3787 = vmatprep.mubr.bf16.mxu1 %v5138_v63 }
 0x267   : > { %3757 = vmatprep.subr.bf16.mxu1 %v5098_v0 }
 0x26a   : > { %3758 = vmatpush1.bf16.msra.mxu1 %v5096_v1 }
 0x26b   : > { %3759 = vmatprep.subr.bf16.mxu1 %v5101_v14 }
 0x26e   : > { %3760 = vmatpush1.bf16.msra.mxu1 %v5099_v18 }
 0x26f   : > { %3761 = vmatprep.subr.bf16.mxu1 %v5104_v8 }
 0x272   : > { %3762 = vmatpush1.bf16.msra.mxu1 %v5102_v54 }
 0x273   : > { %3796 = vmatprep.subr.bf16.mxu1 %v5107_v10 }
 0x338   : > { %v4395_v34 = vpop.f32.mrb[32].mxu1 }
 0x339   : > { %v4396_v48 = vpop.f32.mrb[33].mxu1 }
 0x33a   : > { %v4397_v11 = vadd.f32 %v4396_v48, %v4395_v34 }
 0x33c   : > { %v3633_v27 = vpack.c.bf16 %v4397_v11, %v4397_v11 }
 0x33e   : > { %4178 = vmatmul.mubr.msk.bf16.vlgmr.msra.gmra.mrb[36].mxu1 %vm597_vm2, %v3633_v27 }
 0x33f   : > { %3797 = vmatpush1.bf16.msra.mxu1 %v5105_v28  ;;  %3828 = vmatprep.mubr.bf16.mxu1 %v5138_v63 }
 0x340   : > { %3798 = vmatprep.subr.bf16.mxu1 %v5110_v17 }
 0x343   : > { %3799 = vmatpush1.bf16.msra.mxu1 %v5108_v22 }
 0x344   : > { %3800 = vmatprep.subr.bf16.mxu1 %v5113_v21 }
 0x347   : > { %3801 = vmatpush1.bf16.msra.mxu1 %v5111_v12 }
 0x348   : > { %3802 = vmatprep.subr.bf16.mxu1 %v5116_v29 }
 0x34b   : > { %3803 = vmatpush1.bf16.msra.mxu1 %v5114_v44 }
 0x34e   : > { %4179 = vmatmul.mubr.msk.bf16.vlgmr.msra.gmra.mrb[40].mxu1 %vm597_vm2, %v3633_v27 }
 0x411   : > { %v3789_v35 = vpop.f32.mrb[36].mxu1 }
 0x412   : > { %v3790_v3 = vadd.f32 %v3789_v35, %v3655_v58  ;;  %v3791_v31 = vpop.f32.mrb[37].mxu1 }
 0x413   : > { %v3792_v38 = vadd.f32 %v3791_v31, %v3659_v24  ;;  %v3793_v45 = vpop.f32.mrb[38].mxu1 }
 0x414   : > { %v3837_v46 = vmax.f32 %v3790_v3, 0.0  ;;  %v3794_v56 = vpop.f32.mrb[39].mxu1 }
 0x415   : > { %v3838_v61 = vmax.f32 %v3792_v38, 0.0 }
 0x417   : > { %v3845_v57 = vcombine.low %v3837_v46, %v3838_v61 }
 0x419   : > { %3849 = vst [vmem:[%s248_s30] sm:$0xff] %v3845_v57 }
 0x421   : > { %v3830_v13 = vpop.f32.mrb[40].mxu1 }
 0x422   : > { %v3831_v62 = vadd.f32 %v3830_v13, %v3663_v16  ;;  %v3832_v20 = vpop.f32.mrb[41].mxu1 }
 0x423   : > { %v3833_v40 = vadd.f32 %v3832_v20, %v3667_v4  ;;  %v3834_v33 = vpop.f32.mrb[42].mxu1 }
 0x424   : > { %v3839_v41 = vmax.f32 %v3831_v62, 0.0  ;;  %v3835_v59 = vpop.f32.mrb[43].mxu1 }
 0x425   : > { %v3840_v30 = vmax.f32 %v3833_v40, 0.0 }
 0x427   : > { %v3846_v47 = vcombine.low %v3839_v41, %v3840_v30 }
 0x429   : > { %3850 = vst [vmem:[%s248_s30 + $0x8] sm:$0xff] %v3846_v47 }
 0x42a PF: > { %s16_s21 = sadd.s32 1, %s5135_s21  }
 0x42b   : > { %p13_p4 = scmp.ge.s32.totalorder %s16_s21, 4  }
 0x42d   :  { %15 = sbr.rel (!%p13_p4) target bundleno = 1 (0x1), region = 84 }

</bundles_post_ra>
